<compile_context>
chip_gen: v7x
topology: tpu7x:2x2x1
jax: 0.10.0
libtpu: 0.0.40
codegen_flags: <defaults>
</compile_context>

<pallas_src>
import jax
import jax.numpy as jnp
from jax.experimental import pallas as pl
from jax.experimental.pallas import tpu as pltpu  # noqa: F401  (TPU backend assumed)

HIDDEN = 64
INPUT = 2
NUM_LAYERS = 2


# ------------------------------ Fused kernel --------------------------------
def fused_gru_kernel(x_ref,
                     wi0_ref, wh0_ref, bi0_ref, bh0_ref,
                     wi1_ref, wh1_ref, bi1_ref, bh1_ref,
                     wp_ref, bp_ref,
                     o_ref):
    T, B, I = x_ref.shape
    H = HIDDEN

    # Load all (tiny) weights once; they stay resident in VMEM/vregs.
    wi0 = wi0_ref[...]   # (I, 3H)
    wh0 = wh0_ref[...]   # (H, 3H)
    bi0 = bi0_ref[...]   # (1, 3H)
    bh0 = bh0_ref[...]   # (1, 3H)
    wi1 = wi1_ref[...]   # (H, 3H)
    wh1 = wh1_ref[...]   # (H, 3H)
    bi1 = bi1_ref[...]   # (1, 3H)
    bh1 = bh1_ref[...]   # (1, 3H)

    x = x_ref[...]       # (T, B, I) -- whole sequence, tiny.

    # ---- Layer-0 input projections for ALL steps, hoisted off the recurrence.
    # I is tiny (2), so do it as I VPU broadcast multiply-adds rather than T
    # small MXU pushes.  Bias folded in.
    gi0_all = jnp.broadcast_to(bi0.reshape(1, 1, 3 * H), (T, B, 3 * H))
    for i in range(I):
        gi0_all = gi0_all + x[:, :, i:i + 1] * wi0[i:i + 1, :].reshape(1, 1, 3 * H)

    def gru_cell(gi, gh, h):
        # gi/gh: (B, 3H) with column blocks [r | z | n]
        r = jax.nn.sigmoid(gi[:, 0:H] + gh[:, 0:H])
        z = jax.nn.sigmoid(gi[:, H:2 * H] + gh[:, H:2 * H])
        n = jnp.tanh(gi[:, 2 * H:3 * H] + r * gh[:, 2 * H:3 * H])
        return n + z * (h - n)          # == (1 - z) * n + z * h

    h0 = jnp.zeros((B, H), jnp.float32)
    h1 = jnp.zeros((B, H), jnp.float32)

    # T is a small static trace-time constant -> fully unrolled time loop with
    # static slice indices; only the recurrent dots sit on the serial chain.
    for t in range(T):
        gi0 = gi0_all[t]                                                # (B, 3H)
        gh0 = jnp.dot(h0, wh0, preferred_element_type=jnp.float32) + bh0
        h0 = gru_cell(gi0, gh0, h0)

        gi1 = jnp.dot(h0, wi1, preferred_element_type=jnp.float32) + bi1
        gh1 = jnp.dot(h1, wh1, preferred_element_type=jnp.float32) + bh1
        h1 = gru_cell(gi1, gh1, h1)

    # h_n.permute(1,0,2).flatten(1) == concat([h0_final, h1_final], axis=-1)
    feats = jnp.concatenate([h0, h1], axis=-1)                          # (B, 2H)
    o_ref[...] = (jnp.dot(feats, wp_ref[...],
                          preferred_element_type=jnp.float32)
                  + bp_ref[...])                                        # (B, 1)


def _full(shape):
    n = len(shape)
    return pl.BlockSpec(shape, lambda: (0,) * n)


# --------------------------------- Forward ----------------------------------
@jax.jit
def model_forward(x, params):
    """x: (T, B, 2) float32 -> (B,)  (matches PyTorch model.forward)."""
    T, B, I = x.shape
    H = HIDDEN
    g0, g1 = params["gru"]
    p = params["pred"]

    out = pl.pallas_call(
        fused_gru_kernel,
        out_shape=jax.ShapeDtypeStruct((B, 1), jnp.float32),
        in_specs=[
            _full((T, B, I)),
            _full((I, 3 * H)), _full((H, 3 * H)), _full((1, 3 * H)), _full((1, 3 * H)),
            _full((H, 3 * H)), _full((H, 3 * H)), _full((1, 3 * H)), _full((1, 3 * H)),
            _full((2 * H, 1)), _full((1, 1)),
        ],
        out_specs=_full((B, 1)),
    )(x,
      g0["wi"], g0["wh"], g0["bi"], g0["bh"],
      g1["wi"], g1["wh"], g1["bi"], g1["bh"],
      p["w_t"], p["b"])

    return out.reshape(-1)


# ---------------------------- Parameter creation -----------------------------
def init_params(key):
    """Deterministic init mimicking PyTorch's uniform(-1/sqrt(H), 1/sqrt(H)).

    Layout per GRU layer (gate order r, z, n, columns of the 3H axis):
        wi : (in_size, 3H)   = weight_ih_l{k}.T
        wh : (H, 3H)         = weight_hh_l{k}.T
        bi : (1, 3H), bh : (1, 3H)
    """
    H = HIDDEN
    bound = 1.0 / jnp.sqrt(jnp.float32(H))
    params = {"gru": [], "pred": {}}

    def uni(k, shape, b):
        return jax.random.uniform(k, shape, jnp.float32, -b, b)

    for layer in range(NUM_LAYERS):
        in_size = INPUT if layer == 0 else H
        keys = jax.random.split(jax.random.fold_in(key, layer), 4)
        w_ih = uni(keys[0], (3 * H, in_size), bound)   # rows: [r | z | n]
        w_hh = uni(keys[1], (3 * H, H), bound)
        b_ih = uni(keys[2], (3 * H,), bound)
        b_hh = uni(keys[3], (3 * H,), bound)
        params["gru"].append({
            "wi": w_ih.T,                    # (in_size, 3H)
            "wh": w_hh.T,                    # (H, 3H)
            "bi": b_ih.reshape(1, 3 * H),
            "bh": b_hh.reshape(1, 3 * H),
        })

    pk1, pk2 = jax.random.split(jax.random.fold_in(key, 100))
    pbound = 1.0 / jnp.sqrt(jnp.float32(2 * H))
    w_pred = uni(pk1, (1, 2 * H), pbound)
    b_pred = uni(pk2, (1,), pbound)
    params["pred"]["w_t"] = w_pred.T                 # (128, 1)
    params["pred"]["b"] = b_pred.reshape(1, 1)       # (1, 1)
    return params


# ----------------------------- Pure-JAX reference ----------------------------
def reference_forward(x, params):
    T, B, _ = x.shape
    H = HIDDEN
    finals = []
    inp = x
    for layer in range(NUM_LAYERS):
        g = params["gru"][layer]
        h = jnp.zeros((B, H), jnp.float32)
        outs = []
        for t in range(T):
            gi = inp[t] @ g["wi"] + g["bi"]
            gh = h @ g["wh"] + g["bh"]
            r = jax.nn.sigmoid(gi[:, :H] + gh[:, :H])
            z = jax.nn.sigmoid(gi[:, H:2 * H] + gh[:, H:2 * H])
            n = jnp.tanh(gi[:, 2 * H:] + r * gh[:, 2 * H:])
            h = (1.0 - z) * n + z * h
            outs.append(h)
        inp = jnp.stack(outs)
        finals.append(h)
    feats = jnp.concatenate(finals, axis=-1)
    return (feats @ params["pred"]["w_t"] + params["pred"]["b"]).reshape(-1)


if __name__ == "__main__":
    key = jax.random.PRNGKey(0)
    pkey, xkey = jax.random.split(key)

    params = init_params(pkey)

    T, B = 8, 4                                      # seq_len=8, batch=4
    x = jax.random.normal(xkey, (T, B, INPUT), jnp.float32)

    out = model_forward(x, params)
    jax.block_until_ready(out)
    assert out.shape == (B,), out.shape

    ref = reference_forward(x, params)
    assert jnp.allclose(out, ref, rtol=1e-4, atol=1e-5), (out, ref)

    print("KERNEL_OK")
</pallas_src>

<mosaic_0001>
module attributes {stable_mosaic.version = 11 : i64} {
  func.func @fused_gru_kernel(%arg0: memref<8x4x2xf32, #tpu.memory_space<vmem>>, %arg1: memref<2x192xf32, #tpu.memory_space<vmem>>, %arg2: memref<64x192xf32, #tpu.memory_space<vmem>>, %arg3: memref<1x192xf32, #tpu.memory_space<vmem>>, %arg4: memref<1x192xf32, #tpu.memory_space<vmem>>, %arg5: memref<64x192xf32, #tpu.memory_space<vmem>>, %arg6: memref<64x192xf32, #tpu.memory_space<vmem>>, %arg7: memref<1x192xf32, #tpu.memory_space<vmem>>, %arg8: memref<1x192xf32, #tpu.memory_space<vmem>>, %arg9: memref<128x1xf32, #tpu.memory_space<vmem>>, %arg10: memref<1x1xf32, #tpu.memory_space<vmem>>, %arg11: memref<4x1xf32, #tpu.memory_space<vmem>>) attributes {dimension_semantics = [], scalar_prefetch = 0 : i64, scratch_operands = 0 : i64, tpu.core_type = #tpu.core_type<tc>} {
    %c0 = arith.constant 0 : index
    %c0_0 = arith.constant 0 : index
    %0 = vector.load %arg1[%c0, %c0_0] : memref<2x192xf32, #tpu.memory_space<vmem>>, vector<2x192xf32>
    %c0_1 = arith.constant 0 : index
    %c0_2 = arith.constant 0 : index
    %1 = vector.load %arg2[%c0_1, %c0_2] : memref<64x192xf32, #tpu.memory_space<vmem>>, vector<64x192xf32>
    %c0_3 = arith.constant 0 : index
    %c0_4 = arith.constant 0 : index
    %2 = vector.load %arg3[%c0_3, %c0_4] : memref<1x192xf32, #tpu.memory_space<vmem>>, vector<1x192xf32>
    %c0_5 = arith.constant 0 : index
    %c0_6 = arith.constant 0 : index
    %3 = vector.load %arg4[%c0_5, %c0_6] : memref<1x192xf32, #tpu.memory_space<vmem>>, vector<1x192xf32>
    %c0_7 = arith.constant 0 : index
    %c0_8 = arith.constant 0 : index
    %4 = vector.load %arg5[%c0_7, %c0_8] : memref<64x192xf32, #tpu.memory_space<vmem>>, vector<64x192xf32>
    %c0_9 = arith.constant 0 : index
    %c0_10 = arith.constant 0 : index
    %5 = vector.load %arg6[%c0_9, %c0_10] : memref<64x192xf32, #tpu.memory_space<vmem>>, vector<64x192xf32>
    %c0_11 = arith.constant 0 : index
    %c0_12 = arith.constant 0 : index
    %6 = vector.load %arg7[%c0_11, %c0_12] : memref<1x192xf32, #tpu.memory_space<vmem>>, vector<1x192xf32>
    %c0_13 = arith.constant 0 : index
    %c0_14 = arith.constant 0 : index
    %7 = vector.load %arg8[%c0_13, %c0_14] : memref<1x192xf32, #tpu.memory_space<vmem>>, vector<1x192xf32>
    %c0_15 = arith.constant 0 : index
    %c0_16 = arith.constant 0 : index
    %c0_17 = arith.constant 0 : index
    %8 = vector.load %arg0[%c0_15, %c0_16, %c0_17] : memref<8x4x2xf32, #tpu.memory_space<vmem>>, vector<8x4x2xf32>
    %9 = vector.shape_cast %2 : vector<1x192xf32> to vector<1x1x192xf32>
    %10 = vector.shape_cast %9 : vector<1x1x192xf32> to vector<1x1x192xf32>
    %11 = vector.broadcast %10 : vector<1x1x192xf32> to vector<8x4x192xf32>
    %12 = vector.extract_strided_slice %8 {offsets = [0, 0, 0], sizes = [8, 4, 1], strides = [1, 1, 1]} : vector<8x4x2xf32> to vector<8x4x1xf32>
    %13 = vector.extract_strided_slice %0 {offsets = [0, 0], sizes = [1, 192], strides = [1, 1]} : vector<2x192xf32> to vector<1x192xf32>
    %14 = vector.shape_cast %13 : vector<1x192xf32> to vector<1x1x192xf32>
    %15 = vector.broadcast %12 : vector<8x4x1xf32> to vector<8x4x192xf32>
    %16 = vector.broadcast %14 : vector<1x1x192xf32> to vector<8x4x192xf32>
    %17 = arith.mulf %15, %16 : vector<8x4x192xf32>
    %18 = arith.addf %11, %17 : vector<8x4x192xf32>
    %19 = vector.extract_strided_slice %8 {offsets = [0, 0, 1], sizes = [8, 4, 1], strides = [1, 1, 1]} : vector<8x4x2xf32> to vector<8x4x1xf32>
    %20 = vector.extract_strided_slice %0 {offsets = [1, 0], sizes = [1, 192], strides = [1, 1]} : vector<2x192xf32> to vector<1x192xf32>
    %21 = vector.shape_cast %20 : vector<1x192xf32> to vector<1x1x192xf32>
    %22 = vector.broadcast %19 : vector<8x4x1xf32> to vector<8x4x192xf32>
    %23 = vector.broadcast %21 : vector<1x1x192xf32> to vector<8x4x192xf32>
    %24 = arith.mulf %22, %23 : vector<8x4x192xf32>
    %25 = arith.addf %18, %24 : vector<8x4x192xf32>
    %cst = arith.constant 0.000000e+00 : f32
    %26 = vector.broadcast %cst : f32 to vector<4x64xf32>
    %cst_18 = arith.constant 0.000000e+00 : f32
    %27 = vector.broadcast %cst_18 : f32 to vector<4x64xf32>
    %28 = vector.extract_strided_slice %25 {offsets = [0, 0, 0], sizes = [1, 4, 192], strides = [1, 1, 1]} : vector<8x4x192xf32> to vector<1x4x192xf32>
    %29 = vector.shape_cast %28 : vector<1x4x192xf32> to vector<4x192xf32>
    %cst_19 = arith.constant dense<0.000000e+00> : vector<4x192xf32>
    %30 = tpu.matmul %26, %1, %cst_19 {dimension_numbers = #tpu.dot_dimension_numbers<[1], [0], [0], [1], [0, 0, 1, 1], [], []>} : vector<4x64xf32>, vector<64x192xf32>, vector<4x192xf32> -> vector<4x192xf32>
    %31 = vector.broadcast %3 : vector<1x192xf32> to vector<4x192xf32>
    %32 = arith.addf %30, %31 : vector<4x192xf32>
    %33 = vector.extract_strided_slice %29 {offsets = [0, 0], sizes = [4, 64], strides = [1, 1]} : vector<4x192xf32> to vector<4x64xf32>
    %34 = vector.extract_strided_slice %32 {offsets = [0, 0], sizes = [4, 64], strides = [1, 1]} : vector<4x192xf32> to vector<4x64xf32>
    %35 = arith.addf %33, %34 : vector<4x64xf32>
    %36 = arith.negf %35 : vector<4x64xf32>
    %37 = math.exp %36 : vector<4x64xf32>
    %cst_20 = arith.constant 1.000000e+00 : f32
    %38 = vector.broadcast %cst_20 : f32 to vector<4x64xf32>
    %39 = arith.addf %38, %37 : vector<4x64xf32>
    %40 = arith.divf %38, %39 : vector<4x64xf32>
    %41 = vector.extract_strided_slice %29 {offsets = [0, 64], sizes = [4, 64], strides = [1, 1]} : vector<4x192xf32> to vector<4x64xf32>
    %42 = vector.extract_strided_slice %32 {offsets = [0, 64], sizes = [4, 64], strides = [1, 1]} : vector<4x192xf32> to vector<4x64xf32>
    %43 = arith.addf %41, %42 : vector<4x64xf32>
    %44 = arith.negf %43 : vector<4x64xf32>
    %45 = math.exp %44 : vector<4x64xf32>
    %cst_21 = arith.constant 1.000000e+00 : f32
    %46 = vector.broadcast %cst_21 : f32 to vector<4x64xf32>
    %47 = arith.addf %46, %45 : vector<4x64xf32>
    %48 = arith.divf %46, %47 : vector<4x64xf32>
    %49 = vector.extract_strided_slice %29 {offsets = [0, 128], sizes = [4, 64], strides = [1, 1]} : vector<4x192xf32> to vector<4x64xf32>
    %50 = vector.extract_strided_slice %32 {offsets = [0, 128], sizes = [4, 64], strides = [1, 1]} : vector<4x192xf32> to vector<4x64xf32>
    %51 = arith.mulf %40, %50 : vector<4x64xf32>
    %52 = arith.addf %49, %51 : vector<4x64xf32>
    %53 = math.tanh %52 : vector<4x64xf32>
    %54 = arith.subf %26, %53 : vector<4x64xf32>
    %55 = arith.mulf %48, %54 : vector<4x64xf32>
    %56 = arith.addf %53, %55 : vector<4x64xf32>
    %cst_22 = arith.constant dense<0.000000e+00> : vector<4x192xf32>
    %57 = tpu.matmul %56, %4, %cst_22 {dimension_numbers = #tpu.dot_dimension_numbers<[1], [0], [0], [1], [0, 0, 1, 1], [], []>} : vector<4x64xf32>, vector<64x192xf32>, vector<4x192xf32> -> vector<4x192xf32>
    %58 = vector.broadcast %6 : vector<1x192xf32> to vector<4x192xf32>
    %59 = arith.addf %57, %58 : vector<4x192xf32>
    %cst_23 = arith.constant dense<0.000000e+00> : vector<4x192xf32>
    %60 = tpu.matmul %27, %5, %cst_23 {dimension_numbers = #tpu.dot_dimension_numbers<[1], [0], [0], [1], [0, 0, 1, 1], [], []>} : vector<4x64xf32>, vector<64x192xf32>, vector<4x192xf32> -> vector<4x192xf32>
    %61 = vector.broadcast %7 : vector<1x192xf32> to vector<4x192xf32>
    %62 = arith.addf %60, %61 : vector<4x192xf32>
    %63 = vector.extract_strided_slice %59 {offsets = [0, 0], sizes = [4, 64], strides = [1, 1]} : vector<4x192xf32> to vector<4x64xf32>
    %64 = vector.extract_strided_slice %62 {offsets = [0, 0], sizes = [4, 64], strides = [1, 1]} : vector<4x192xf32> to vector<4x64xf32>
    %65 = arith.addf %63, %64 : vector<4x64xf32>
    %66 = arith.negf %65 : vector<4x64xf32>
    %67 = math.exp %66 : vector<4x64xf32>
    %cst_24 = arith.constant 1.000000e+00 : f32
    %68 = vector.broadcast %cst_24 : f32 to vector<4x64xf32>
    %69 = arith.addf %68, %67 : vector<4x64xf32>
    %70 = arith.divf %68, %69 : vector<4x64xf32>
    %71 = vector.extract_strided_slice %59 {offsets = [0, 64], sizes = [4, 64], strides = [1, 1]} : vector<4x192xf32> to vector<4x64xf32>
    %72 = vector.extract_strided_slice %62 {offsets = [0, 64], sizes = [4, 64], strides = [1, 1]} : vector<4x192xf32> to vector<4x64xf32>
    %73 = arith.addf %71, %72 : vector<4x64xf32>
    %74 = arith.negf %73 : vector<4x64xf32>
    %75 = math.exp %74 : vector<4x64xf32>
    %cst_25 = arith.constant 1.000000e+00 : f32
    %76 = vector.broadcast %cst_25 : f32 to vector<4x64xf32>
    %77 = arith.addf %76, %75 : vector<4x64xf32>
    %78 = arith.divf %76, %77 : vector<4x64xf32>
    %79 = vector.extract_strided_slice %59 {offsets = [0, 128], sizes = [4, 64], strides = [1, 1]} : vector<4x192xf32> to vector<4x64xf32>
    %80 = vector.extract_strided_slice %62 {offsets = [0, 128], sizes = [4, 64], strides = [1, 1]} : vector<4x192xf32> to vector<4x64xf32>
    %81 = arith.mulf %70, %80 : vector<4x64xf32>
    %82 = arith.addf %79, %81 : vector<4x64xf32>
    %83 = math.tanh %82 : vector<4x64xf32>
    %84 = arith.subf %27, %83 : vector<4x64xf32>
    %85 = arith.mulf %78, %84 : vector<4x64xf32>
    %86 = arith.addf %83, %85 : vector<4x64xf32>
    %87 = vector.extract_strided_slice %25 {offsets = [1, 0, 0], sizes = [1, 4, 192], strides = [1, 1, 1]} : vector<8x4x192xf32> to vector<1x4x192xf32>
    %88 = vector.shape_cast %87 : vector<1x4x192xf32> to vector<4x192xf32>
    %cst_26 = arith.constant dense<0.000000e+00> : vector<4x192xf32>
    %89 = tpu.matmul %56, %1, %cst_26 {dimension_numbers = #tpu.dot_dimension_numbers<[1], [0], [0], [1], [0, 0, 1, 1], [], []>} : vector<4x64xf32>, vector<64x192xf32>, vector<4x192xf32> -> vector<4x192xf32>
    %90 = vector.broadcast %3 : vector<1x192xf32> to vector<4x192xf32>
    %91 = arith.addf %89, %90 : vector<4x192xf32>
    %92 = vector.extract_strided_slice %88 {offsets = [0, 0], sizes = [4, 64], strides = [1, 1]} : vector<4x192xf32> to vector<4x64xf32>
    %93 = vector.extract_strided_slice %91 {offsets = [0, 0], sizes = [4, 64], strides = [1, 1]} : vector<4x192xf32> to vector<4x64xf32>
    %94 = arith.addf %92, %93 : vector<4x64xf32>
    %95 = arith.negf %94 : vector<4x64xf32>
    %96 = math.exp %95 : vector<4x64xf32>
    %cst_27 = arith.constant 1.000000e+00 : f32
    %97 = vector.broadcast %cst_27 : f32 to vector<4x64xf32>
    %98 = arith.addf %97, %96 : vector<4x64xf32>
    %99 = arith.divf %97, %98 : vector<4x64xf32>
    %100 = vector.extract_strided_slice %88 {offsets = [0, 64], sizes = [4, 64], strides = [1, 1]} : vector<4x192xf32> to vector<4x64xf32>
    %101 = vector.extract_strided_slice %91 {offsets = [0, 64], sizes = [4, 64], strides = [1, 1]} : vector<4x192xf32> to vector<4x64xf32>
    %102 = arith.addf %100, %101 : vector<4x64xf32>
    %103 = arith.negf %102 : vector<4x64xf32>
    %104 = math.exp %103 : vector<4x64xf32>
    %cst_28 = arith.constant 1.000000e+00 : f32
    %105 = vector.broadcast %cst_28 : f32 to vector<4x64xf32>
    %106 = arith.addf %105, %104 : vector<4x64xf32>
    %107 = arith.divf %105, %106 : vector<4x64xf32>
    %108 = vector.extract_strided_slice %88 {offsets = [0, 128], sizes = [4, 64], strides = [1, 1]} : vector<4x192xf32> to vector<4x64xf32>
    %109 = vector.extract_strided_slice %91 {offsets = [0, 128], sizes = [4, 64], strides = [1, 1]} : vector<4x192xf32> to vector<4x64xf32>
    %110 = arith.mulf %99, %109 : vector<4x64xf32>
    %111 = arith.addf %108, %110 : vector<4x64xf32>
    %112 = math.tanh %111 : vector<4x64xf32>
    %113 = arith.subf %56, %112 : vector<4x64xf32>
    %114 = arith.mulf %107, %113 : vector<4x64xf32>
    %115 = arith.addf %112, %114 : vector<4x64xf32>
    %cst_29 = arith.constant dense<0.000000e+00> : vector<4x192xf32>
    %116 = tpu.matmul %115, %4, %cst_29 {dimension_numbers = #tpu.dot_dimension_numbers<[1], [0], [0], [1], [0, 0, 1, 1], [], []>} : vector<4x64xf32>, vector<64x192xf32>, vector<4x192xf32> -> vector<4x192xf32>
    %117 = vector.broadcast %6 : vector<1x192xf32> to vector<4x192xf32>
    %118 = arith.addf %116, %117 : vector<4x192xf32>
    %cst_30 = arith.constant dense<0.000000e+00> : vector<4x192xf32>
    %119 = tpu.matmul %86, %5, %cst_30 {dimension_numbers = #tpu.dot_dimension_numbers<[1], [0], [0], [1], [0, 0, 1, 1], [], []>} : vector<4x64xf32>, vector<64x192xf32>, vector<4x192xf32> -> vector<4x192xf32>
    %120 = vector.broadcast %7 : vector<1x192xf32> to vector<4x192xf32>
    %121 = arith.addf %119, %120 : vector<4x192xf32>
    %122 = vector.extract_strided_slice %118 {offsets = [0, 0], sizes = [4, 64], strides = [1, 1]} : vector<4x192xf32> to vector<4x64xf32>
    %123 = vector.extract_strided_slice %121 {offsets = [0, 0], sizes = [4, 64], strides = [1, 1]} : vector<4x192xf32> to vector<4x64xf32>
    %124 = arith.addf %122, %123 : vector<4x64xf32>
    %125 = arith.negf %124 : vector<4x64xf32>
    %126 = math.exp %125 : vector<4x64xf32>
    %cst_31 = arith.constant 1.000000e+00 : f32
    %127 = vector.broadcast %cst_31 : f32 to vector<4x64xf32>
    %128 = arith.addf %127, %126 : vector<4x64xf32>
    %129 = arith.divf %127, %128 : vector<4x64xf32>
    %130 = vector.extract_strided_slice %118 {offsets = [0, 64], sizes = [4, 64], strides = [1, 1]} : vector<4x192xf32> to vector<4x64xf32>
    %131 = vector.extract_strided_slice %121 {offsets = [0, 64], sizes = [4, 64], strides = [1, 1]} : vector<4x192xf32> to vector<4x64xf32>
    %132 = arith.addf %130, %131 : vector<4x64xf32>
    %133 = arith.negf %132 : vector<4x64xf32>
    %134 = math.exp %133 : vector<4x64xf32>
    %cst_32 = arith.constant 1.000000e+00 : f32
    %135 = vector.broadcast %cst_32 : f32 to vector<4x64xf32>
    %136 = arith.addf %135, %134 : vector<4x64xf32>
    %137 = arith.divf %135, %136 : vector<4x64xf32>
    %138 = vector.extract_strided_slice %118 {offsets = [0, 128], sizes = [4, 64], strides = [1, 1]} : vector<4x192xf32> to vector<4x64xf32>
    %139 = vector.extract_strided_slice %121 {offsets = [0, 128], sizes = [4, 64], strides = [1, 1]} : vector<4x192xf32> to vector<4x64xf32>
    %140 = arith.mulf %129, %139 : vector<4x64xf32>
    %141 = arith.addf %138, %140 : vector<4x64xf32>
    %142 = math.tanh %141 : vector<4x64xf32>
    %143 = arith.subf %86, %142 : vector<4x64xf32>
    %144 = arith.mulf %137, %143 : vector<4x64xf32>
    %145 = arith.addf %142, %144 : vector<4x64xf32>
    %146 = vector.extract_strided_slice %25 {offsets = [2, 0, 0], sizes = [1, 4, 192], strides = [1, 1, 1]} : vector<8x4x192xf32> to vector<1x4x192xf32>
    %147 = vector.shape_cast %146 : vector<1x4x192xf32> to vector<4x192xf32>
    %cst_33 = arith.constant dense<0.000000e+00> : vector<4x192xf32>
    %148 = tpu.matmul %115, %1, %cst_33 {dimension_numbers = #tpu.dot_dimension_numbers<[1], [0], [0], [1], [0, 0, 1, 1], [], []>} : vector<4x64xf32>, vector<64x192xf32>, vector<4x192xf32> -> vector<4x192xf32>
    %149 = vector.broadcast %3 : vector<1x192xf32> to vector<4x192xf32>
    %150 = arith.addf %148, %149 : vector<4x192xf32>
    %151 = vector.extract_strided_slice %147 {offsets = [0, 0], sizes = [4, 64], strides = [1, 1]} : vector<4x192xf32> to vector<4x64xf32>
    %152 = vector.extract_strided_slice %150 {offsets = [0, 0], sizes = [4, 64], strides = [1, 1]} : vector<4x192xf32> to vector<4x64xf32>
    %153 = arith.addf %151, %152 : vector<4x64xf32>
    %154 = arith.negf %153 : vector<4x64xf32>
    %155 = math.exp %154 : vector<4x64xf32>
    %cst_34 = arith.constant 1.000000e+00 : f32
    %156 = vector.broadcast %cst_34 : f32 to vector<4x64xf32>
    %157 = arith.addf %156, %155 : vector<4x64xf32>
    %158 = arith.divf %156, %157 : vector<4x64xf32>
    %159 = vector.extract_strided_slice %147 {offsets = [0, 64], sizes = [4, 64], strides = [1, 1]} : vector<4x192xf32> to vector<4x64xf32>
    %160 = vector.extract_strided_slice %150 {offsets = [0, 64], sizes = [4, 64], strides = [1, 1]} : vector<4x192xf32> to vector<4x64xf32>
    %161 = arith.addf %159, %160 : vector<4x64xf32>
    %162 = arith.negf %161 : vector<4x64xf32>
    %163 = math.exp %162 : vector<4x64xf32>
    %cst_35 = arith.constant 1.000000e+00 : f32
    %164 = vector.broadcast %cst_35 : f32 to vector<4x64xf32>
    %165 = arith.addf %164, %163 : vector<4x64xf32>
    %166 = arith.divf %164, %165 : vector<4x64xf32>
    %167 = vector.extract_strided_slice %147 {offsets = [0, 128], sizes = [4, 64], strides = [1, 1]} : vector<4x192xf32> to vector<4x64xf32>
    %168 = vector.extract_strided_slice %150 {offsets = [0, 128], sizes = [4, 64], strides = [1, 1]} : vector<4x192xf32> to vector<4x64xf32>
    %169 = arith.mulf %158, %168 : vector<4x64xf32>
    %170 = arith.addf %167, %169 : vector<4x64xf32>
    %171 = math.tanh %170 : vector<4x64xf32>
    %172 = arith.subf %115, %171 : vector<4x64xf32>
    %173 = arith.mulf %166, %172 : vector<4x64xf32>
    %174 = arith.addf %171, %173 : vector<4x64xf32>
    %cst_36 = arith.constant dense<0.000000e+00> : vector<4x192xf32>
    %175 = tpu.matmul %174, %4, %cst_36 {dimension_numbers = #tpu.dot_dimension_numbers<[1], [0], [0], [1], [0, 0, 1, 1], [], []>} : vector<4x64xf32>, vector<64x192xf32>, vector<4x192xf32> -> vector<4x192xf32>
    %176 = vector.broadcast %6 : vector<1x192xf32> to vector<4x192xf32>
    %177 = arith.addf %175, %176 : vector<4x192xf32>
    %cst_37 = arith.constant dense<0.000000e+00> : vector<4x192xf32>
    %178 = tpu.matmul %145, %5, %cst_37 {dimension_numbers = #tpu.dot_dimension_numbers<[1], [0], [0], [1], [0, 0, 1, 1], [], []>} : vector<4x64xf32>, vector<64x192xf32>, vector<4x192xf32> -> vector<4x192xf32>
    %179 = vector.broadcast %7 : vector<1x192xf32> to vector<4x192xf32>
    %180 = arith.addf %178, %179 : vector<4x192xf32>
    %181 = vector.extract_strided_slice %177 {offsets = [0, 0], sizes = [4, 64], strides = [1, 1]} : vector<4x192xf32> to vector<4x64xf32>
    %182 = vector.extract_strided_slice %180 {offsets = [0, 0], sizes = [4, 64], strides = [1, 1]} : vector<4x192xf32> to vector<4x64xf32>
    %183 = arith.addf %181, %182 : vector<4x64xf32>
    %184 = arith.negf %183 : vector<4x64xf32>
    %185 = math.exp %184 : vector<4x64xf32>
    %cst_38 = arith.constant 1.000000e+00 : f32
    %186 = vector.broadcast %cst_38 : f32 to vector<4x64xf32>
    %187 = arith.addf %186, %185 : vector<4x64xf32>
    %188 = arith.divf %186, %187 : vector<4x64xf32>
    %189 = vector.extract_strided_slice %177 {offsets = [0, 64], sizes = [4, 64], strides = [1, 1]} : vector<4x192xf32> to vector<4x64xf32>
    %190 = vector.extract_strided_slice %180 {offsets = [0, 64], sizes = [4, 64], strides = [1, 1]} : vector<4x192xf32> to vector<4x64xf32>
    %191 = arith.addf %189, %190 : vector<4x64xf32>
    %192 = arith.negf %191 : vector<4x64xf32>
    %193 = math.exp %192 : vector<4x64xf32>
    %cst_39 = arith.constant 1.000000e+00 : f32
    %194 = vector.broadcast %cst_39 : f32 to vector<4x64xf32>
    %195 = arith.addf %194, %193 : vector<4x64xf32>
    %196 = arith.divf %194, %195 : vector<4x64xf32>
    %197 = vector.extract_strided_slice %177 {offsets = [0, 128], sizes = [4, 64], strides = [1, 1]} : vector<4x192xf32> to vector<4x64xf32>
    %198 = vector.extract_strided_slice %180 {offsets = [0, 128], sizes = [4, 64], strides = [1, 1]} : vector<4x192xf32> to vector<4x64xf32>
    %199 = arith.mulf %188, %198 : vector<4x64xf32>
    %200 = arith.addf %197, %199 : vector<4x64xf32>
    %201 = math.tanh %200 : vector<4x64xf32>
    %202 = arith.subf %145, %201 : vector<4x64xf32>
    %203 = arith.mulf %196, %202 : vector<4x64xf32>
    %204 = arith.addf %201, %203 : vector<4x64xf32>
    %205 = vector.extract_strided_slice %25 {offsets = [3, 0, 0], sizes = [1, 4, 192], strides = [1, 1, 1]} : vector<8x4x192xf32> to vector<1x4x192xf32>
    %206 = vector.shape_cast %205 : vector<1x4x192xf32> to vector<4x192xf32>
    %cst_40 = arith.constant dense<0.000000e+00> : vector<4x192xf32>
    %207 = tpu.matmul %174, %1, %cst_40 {dimension_numbers = #tpu.dot_dimension_numbers<[1], [0], [0], [1], [0, 0, 1, 1], [], []>} : vector<4x64xf32>, vector<64x192xf32>, vector<4x192xf32> -> vector<4x192xf32>
    %208 = vector.broadcast %3 : vector<1x192xf32> to vector<4x192xf32>
    %209 = arith.addf %207, %208 : vector<4x192xf32>
    %210 = vector.extract_strided_slice %206 {offsets = [0, 0], sizes = [4, 64], strides = [1, 1]} : vector<4x192xf32> to vector<4x64xf32>
    %211 = vector.extract_strided_slice %209 {offsets = [0, 0], sizes = [4, 64], strides = [1, 1]} : vector<4x192xf32> to vector<4x64xf32>
    %212 = arith.addf %210, %211 : vector<4x64xf32>
    %213 = arith.negf %212 : vector<4x64xf32>
    %214 = math.exp %213 : vector<4x64xf32>
    %cst_41 = arith.constant 1.000000e+00 : f32
    %215 = vector.broadcast %cst_41 : f32 to vector<4x64xf32>
    %216 = arith.addf %215, %214 : vector<4x64xf32>
    %217 = arith.divf %215, %216 : vector<4x64xf32>
    %218 = vector.extract_strided_slice %206 {offsets = [0, 64], sizes = [4, 64], strides = [1, 1]} : vector<4x192xf32> to vector<4x64xf32>
    %219 = vector.extract_strided_slice %209 {offsets = [0, 64], sizes = [4, 64], strides = [1, 1]} : vector<4x192xf32> to vector<4x64xf32>
    %220 = arith.addf %218, %219 : vector<4x64xf32>
    %221 = arith.negf %220 : vector<4x64xf32>
    %222 = math.exp %221 : vector<4x64xf32>
    %cst_42 = arith.constant 1.000000e+00 : f32
    %223 = vector.broadcast %cst_42 : f32 to vector<4x64xf32>
    %224 = arith.addf %223, %222 : vector<4x64xf32>
    %225 = arith.divf %223, %224 : vector<4x64xf32>
    %226 = vector.extract_strided_slice %206 {offsets = [0, 128], sizes = [4, 64], strides = [1, 1]} : vector<4x192xf32> to vector<4x64xf32>
    %227 = vector.extract_strided_slice %209 {offsets = [0, 128], sizes = [4, 64], strides = [1, 1]} : vector<4x192xf32> to vector<4x64xf32>
    %228 = arith.mulf %217, %227 : vector<4x64xf32>
    %229 = arith.addf %226, %228 : vector<4x64xf32>
    %230 = math.tanh %229 : vector<4x64xf32>
    %231 = arith.subf %174, %230 : vector<4x64xf32>
    %232 = arith.mulf %225, %231 : vector<4x64xf32>
    %233 = arith.addf %230, %232 : vector<4x64xf32>
    %cst_43 = arith.constant dense<0.000000e+00> : vector<4x192xf32>
    %234 = tpu.matmul %233, %4, %cst_43 {dimension_numbers = #tpu.dot_dimension_numbers<[1], [0], [0], [1], [0, 0, 1, 1], [], []>} : vector<4x64xf32>, vector<64x192xf32>, vector<4x192xf32> -> vector<4x192xf32>
    %235 = vector.broadcast %6 : vector<1x192xf32> to vector<4x192xf32>
    %236 = arith.addf %234, %235 : vector<4x192xf32>
    %cst_44 = arith.constant dense<0.000000e+00> : vector<4x192xf32>
    %237 = tpu.matmul %204, %5, %cst_44 {dimension_numbers = #tpu.dot_dimension_numbers<[1], [0], [0], [1], [0, 0, 1, 1], [], []>} : vector<4x64xf32>, vector<64x192xf32>, vector<4x192xf32> -> vector<4x192xf32>
    %238 = vector.broadcast %7 : vector<1x192xf32> to vector<4x192xf32>
    %239 = arith.addf %237, %238 : vector<4x192xf32>
    %240 = vector.extract_strided_slice %236 {offsets = [0, 0], sizes = [4, 64], strides = [1, 1]} : vector<4x192xf32> to vector<4x64xf32>
    %241 = vector.extract_strided_slice %239 {offsets = [0, 0], sizes = [4, 64], strides = [1, 1]} : vector<4x192xf32> to vector<4x64xf32>
    %242 = arith.addf %240, %241 : vector<4x64xf32>
    %243 = arith.negf %242 : vector<4x64xf32>
    %244 = math.exp %243 : vector<4x64xf32>
    %cst_45 = arith.constant 1.000000e+00 : f32
    %245 = vector.broadcast %cst_45 : f32 to vector<4x64xf32>
    %246 = arith.addf %245, %244 : vector<4x64xf32>
    %247 = arith.divf %245, %246 : vector<4x64xf32>
    %248 = vector.extract_strided_slice %236 {offsets = [0, 64], sizes = [4, 64], strides = [1, 1]} : vector<4x192xf32> to vector<4x64xf32>
    %249 = vector.extract_strided_slice %239 {offsets = [0, 64], sizes = [4, 64], strides = [1, 1]} : vector<4x192xf32> to vector<4x64xf32>
    %250 = arith.addf %248, %249 : vector<4x64xf32>
    %251 = arith.negf %250 : vector<4x64xf32>
    %252 = math.exp %251 : vector<4x64xf32>
    %cst_46 = arith.constant 1.000000e+00 : f32
    %253 = vector.broadcast %cst_46 : f32 to vector<4x64xf32>
    %254 = arith.addf %253, %252 : vector<4x64xf32>
    %255 = arith.divf %253, %254 : vector<4x64xf32>
    %256 = vector.extract_strided_slice %236 {offsets = [0, 128], sizes = [4, 64], strides = [1, 1]} : vector<4x192xf32> to vector<4x64xf32>
    %257 = vector.extract_strided_slice %239 {offsets = [0, 128], sizes = [4, 64], strides = [1, 1]} : vector<4x192xf32> to vector<4x64xf32>
    %258 = arith.mulf %247, %257 : vector<4x64xf32>
    %259 = arith.addf %256, %258 : vector<4x64xf32>
    %260 = math.tanh %259 : vector<4x64xf32>
    %261 = arith.subf %204, %260 : vector<4x64xf32>
    %262 = arith.mulf %255, %261 : vector<4x64xf32>
    %263 = arith.addf %260, %262 : vector<4x64xf32>
    %264 = vector.extract_strided_slice %25 {offsets = [4, 0, 0], sizes = [1, 4, 192], strides = [1, 1, 1]} : vector<8x4x192xf32> to vector<1x4x192xf32>
    %265 = vector.shape_cast %264 : vector<1x4x192xf32> to vector<4x192xf32>
    %cst_47 = arith.constant dense<0.000000e+00> : vector<4x192xf32>
    %266 = tpu.matmul %233, %1, %cst_47 {dimension_numbers = #tpu.dot_dimension_numbers<[1], [0], [0], [1], [0, 0, 1, 1], [], []>} : vector<4x64xf32>, vector<64x192xf32>, vector<4x192xf32> -> vector<4x192xf32>
    %267 = vector.broadcast %3 : vector<1x192xf32> to vector<4x192xf32>
    %268 = arith.addf %266, %267 : vector<4x192xf32>
    %269 = vector.extract_strided_slice %265 {offsets = [0, 0], sizes = [4, 64], strides = [1, 1]} : vector<4x192xf32> to vector<4x64xf32>
    %270 = vector.extract_strided_slice %268 {offsets = [0, 0], sizes = [4, 64], strides = [1, 1]} : vector<4x192xf32> to vector<4x64xf32>
    %271 = arith.addf %269, %270 : vector<4x64xf32>
    %272 = arith.negf %271 : vector<4x64xf32>
    %273 = math.exp %272 : vector<4x64xf32>
    %cst_48 = arith.constant 1.000000e+00 : f32
    %274 = vector.broadcast %cst_48 : f32 to vector<4x64xf32>
    %275 = arith.addf %274, %273 : vector<4x64xf32>
    %276 = arith.divf %274, %275 : vector<4x64xf32>
    %277 = vector.extract_strided_slice %265 {offsets = [0, 64], sizes = [4, 64], strides = [1, 1]} : vector<4x192xf32> to vector<4x64xf32>
    %278 = vector.extract_strided_slice %268 {offsets = [0, 64], sizes = [4, 64], strides = [1, 1]} : vector<4x192xf32> to vector<4x64xf32>
    %279 = arith.addf %277, %278 : vector<4x64xf32>
    %280 = arith.negf %279 : vector<4x64xf32>
    %281 = math.exp %280 : vector<4x64xf32>
    %cst_49 = arith.constant 1.000000e+00 : f32
    %282 = vector.broadcast %cst_49 : f32 to vector<4x64xf32>
    %283 = arith.addf %282, %281 : vector<4x64xf32>
    %284 = arith.divf %282, %283 : vector<4x64xf32>
    %285 = vector.extract_strided_slice %265 {offsets = [0, 128], sizes = [4, 64], strides = [1, 1]} : vector<4x192xf32> to vector<4x64xf32>
    %286 = vector.extract_strided_slice %268 {offsets = [0, 128], sizes = [4, 64], strides = [1, 1]} : vector<4x192xf32> to vector<4x64xf32>
    %287 = arith.mulf %276, %286 : vector<4x64xf32>
    %288 = arith.addf %285, %287 : vector<4x64xf32>
    %289 = math.tanh %288 : vector<4x64xf32>
    %290 = arith.subf %233, %289 : vector<4x64xf32>
    %291 = arith.mulf %284, %290 : vector<4x64xf32>
    %292 = arith.addf %289, %291 : vector<4x64xf32>
    %cst_50 = arith.constant dense<0.000000e+00> : vector<4x192xf32>
    %293 = tpu.matmul %292, %4, %cst_50 {dimension_numbers = #tpu.dot_dimension_numbers<[1], [0], [0], [1], [0, 0, 1, 1], [], []>} : vector<4x64xf32>, vector<64x192xf32>, vector<4x192xf32> -> vector<4x192xf32>
    %294 = vector.broadcast %6 : vector<1x192xf32> to vector<4x192xf32>
    %295 = arith.addf %293, %294 : vector<4x192xf32>
    %cst_51 = arith.constant dense<0.000000e+00> : vector<4x192xf32>
    %296 = tpu.matmul %263, %5, %cst_51 {dimension_numbers = #tpu.dot_dimension_numbers<[1], [0], [0], [1], [0, 0, 1, 1], [], []>} : vector<4x64xf32>, vector<64x192xf32>, vector<4x192xf32> -> vector<4x192xf32>
    %297 = vector.broadcast %7 : vector<1x192xf32> to vector<4x192xf32>
    %298 = arith.addf %296, %297 : vector<4x192xf32>
    %299 = vector.extract_strided_slice %295 {offsets = [0, 0], sizes = [4, 64], strides = [1, 1]} : vector<4x192xf32> to vector<4x64xf32>
    %300 = vector.extract_strided_slice %298 {offsets = [0, 0], sizes = [4, 64], strides = [1, 1]} : vector<4x192xf32> to vector<4x64xf32>
    %301 = arith.addf %299, %300 : vector<4x64xf32>
    %302 = arith.negf %301 : vector<4x64xf32>
    %303 = math.exp %302 : vector<4x64xf32>
    %cst_52 = arith.constant 1.000000e+00 : f32
    %304 = vector.broadcast %cst_52 : f32 to vector<4x64xf32>
    %305 = arith.addf %304, %303 : vector<4x64xf32>
    %306 = arith.divf %304, %305 : vector<4x64xf32>
    %307 = vector.extract_strided_slice %295 {offsets = [0, 64], sizes = [4, 64], strides = [1, 1]} : vector<4x192xf32> to vector<4x64xf32>
    %308 = vector.extract_strided_slice %298 {offsets = [0, 64], sizes = [4, 64], strides = [1, 1]} : vector<4x192xf32> to vector<4x64xf32>
    %309 = arith.addf %307, %308 : vector<4x64xf32>
    %310 = arith.negf %309 : vector<4x64xf32>
    %311 = math.exp %310 : vector<4x64xf32>
    %cst_53 = arith.constant 1.000000e+00 : f32
    %312 = vector.broadcast %cst_53 : f32 to vector<4x64xf32>
    %313 = arith.addf %312, %311 : vector<4x64xf32>
    %314 = arith.divf %312, %313 : vector<4x64xf32>
    %315 = vector.extract_strided_slice %295 {offsets = [0, 128], sizes = [4, 64], strides = [1, 1]} : vector<4x192xf32> to vector<4x64xf32>
    %316 = vector.extract_strided_slice %298 {offsets = [0, 128], sizes = [4, 64], strides = [1, 1]} : vector<4x192xf32> to vector<4x64xf32>
    %317 = arith.mulf %306, %316 : vector<4x64xf32>
    %318 = arith.addf %315, %317 : vector<4x64xf32>
    %319 = math.tanh %318 : vector<4x64xf32>
    %320 = arith.subf %263, %319 : vector<4x64xf32>
    %321 = arith.mulf %314, %320 : vector<4x64xf32>
    %322 = arith.addf %319, %321 : vector<4x64xf32>
    %323 = vector.extract_strided_slice %25 {offsets = [5, 0, 0], sizes = [1, 4, 192], strides = [1, 1, 1]} : vector<8x4x192xf32> to vector<1x4x192xf32>
    %324 = vector.shape_cast %323 : vector<1x4x192xf32> to vector<4x192xf32>
    %cst_54 = arith.constant dense<0.000000e+00> : vector<4x192xf32>
    %325 = tpu.matmul %292, %1, %cst_54 {dimension_numbers = #tpu.dot_dimension_numbers<[1], [0], [0], [1], [0, 0, 1, 1], [], []>} : vector<4x64xf32>, vector<64x192xf32>, vector<4x192xf32> -> vector<4x192xf32>
    %326 = vector.broadcast %3 : vector<1x192xf32> to vector<4x192xf32>
    %327 = arith.addf %325, %326 : vector<4x192xf32>
    %328 = vector.extract_strided_slice %324 {offsets = [0, 0], sizes = [4, 64], strides = [1, 1]} : vector<4x192xf32> to vector<4x64xf32>
    %329 = vector.extract_strided_slice %327 {offsets = [0, 0], sizes = [4, 64], strides = [1, 1]} : vector<4x192xf32> to vector<4x64xf32>
    %330 = arith.addf %328, %329 : vector<4x64xf32>
    %331 = arith.negf %330 : vector<4x64xf32>
    %332 = math.exp %331 : vector<4x64xf32>
    %cst_55 = arith.constant 1.000000e+00 : f32
    %333 = vector.broadcast %cst_55 : f32 to vector<4x64xf32>
    %334 = arith.addf %333, %332 : vector<4x64xf32>
    %335 = arith.divf %333, %334 : vector<4x64xf32>
    %336 = vector.extract_strided_slice %324 {offsets = [0, 64], sizes = [4, 64], strides = [1, 1]} : vector<4x192xf32> to vector<4x64xf32>
    %337 = vector.extract_strided_slice %327 {offsets = [0, 64], sizes = [4, 64], strides = [1, 1]} : vector<4x192xf32> to vector<4x64xf32>
    %338 = arith.addf %336, %337 : vector<4x64xf32>
    %339 = arith.negf %338 : vector<4x64xf32>
    %340 = math.exp %339 : vector<4x64xf32>
    %cst_56 = arith.constant 1.000000e+00 : f32
    %341 = vector.broadcast %cst_56 : f32 to vector<4x64xf32>
    %342 = arith.addf %341, %340 : vector<4x64xf32>
    %343 = arith.divf %341, %342 : vector<4x64xf32>
    %344 = vector.extract_strided_slice %324 {offsets = [0, 128], sizes = [4, 64], strides = [1, 1]} : vector<4x192xf32> to vector<4x64xf32>
    %345 = vector.extract_strided_slice %327 {offsets = [0, 128], sizes = [4, 64], strides = [1, 1]} : vector<4x192xf32> to vector<4x64xf32>
    %346 = arith.mulf %335, %345 : vector<4x64xf32>
    %347 = arith.addf %344, %346 : vector<4x64xf32>
    %348 = math.tanh %347 : vector<4x64xf32>
    %349 = arith.subf %292, %348 : vector<4x64xf32>
    %350 = arith.mulf %343, %349 : vector<4x64xf32>
    %351 = arith.addf %348, %350 : vector<4x64xf32>
    %cst_57 = arith.constant dense<0.000000e+00> : vector<4x192xf32>
    %352 = tpu.matmul %351, %4, %cst_57 {dimension_numbers = #tpu.dot_dimension_numbers<[1], [0], [0], [1], [0, 0, 1, 1], [], []>} : vector<4x64xf32>, vector<64x192xf32>, vector<4x192xf32> -> vector<4x192xf32>
    %353 = vector.broadcast %6 : vector<1x192xf32> to vector<4x192xf32>
    %354 = arith.addf %352, %353 : vector<4x192xf32>
    %cst_58 = arith.constant dense<0.000000e+00> : vector<4x192xf32>
    %355 = tpu.matmul %322, %5, %cst_58 {dimension_numbers = #tpu.dot_dimension_numbers<[1], [0], [0], [1], [0, 0, 1, 1], [], []>} : vector<4x64xf32>, vector<64x192xf32>, vector<4x192xf32> -> vector<4x192xf32>
    %356 = vector.broadcast %7 : vector<1x192xf32> to vector<4x192xf32>
    %357 = arith.addf %355, %356 : vector<4x192xf32>
    %358 = vector.extract_strided_slice %354 {offsets = [0, 0], sizes = [4, 64], strides = [1, 1]} : vector<4x192xf32> to vector<4x64xf32>
    %359 = vector.extract_strided_slice %357 {offsets = [0, 0], sizes = [4, 64], strides = [1, 1]} : vector<4x192xf32> to vector<4x64xf32>
    %360 = arith.addf %358, %359 : vector<4x64xf32>
    %361 = arith.negf %360 : vector<4x64xf32>
    %362 = math.exp %361 : vector<4x64xf32>
    %cst_59 = arith.constant 1.000000e+00 : f32
    %363 = vector.broadcast %cst_59 : f32 to vector<4x64xf32>
    %364 = arith.addf %363, %362 : vector<4x64xf32>
    %365 = arith.divf %363, %364 : vector<4x64xf32>
    %366 = vector.extract_strided_slice %354 {offsets = [0, 64], sizes = [4, 64], strides = [1, 1]} : vector<4x192xf32> to vector<4x64xf32>
    %367 = vector.extract_strided_slice %357 {offsets = [0, 64], sizes = [4, 64], strides = [1, 1]} : vector<4x192xf32> to vector<4x64xf32>
    %368 = arith.addf %366, %367 : vector<4x64xf32>
    %369 = arith.negf %368 : vector<4x64xf32>
    %370 = math.exp %369 : vector<4x64xf32>
    %cst_60 = arith.constant 1.000000e+00 : f32
    %371 = vector.broadcast %cst_60 : f32 to vector<4x64xf32>
    %372 = arith.addf %371, %370 : vector<4x64xf32>
    %373 = arith.divf %371, %372 : vector<4x64xf32>
    %374 = vector.extract_strided_slice %354 {offsets = [0, 128], sizes = [4, 64], strides = [1, 1]} : vector<4x192xf32> to vector<4x64xf32>
    %375 = vector.extract_strided_slice %357 {offsets = [0, 128], sizes = [4, 64], strides = [1, 1]} : vector<4x192xf32> to vector<4x64xf32>
    %376 = arith.mulf %365, %375 : vector<4x64xf32>
    %377 = arith.addf %374, %376 : vector<4x64xf32>
    %378 = math.tanh %377 : vector<4x64xf32>
    %379 = arith.subf %322, %378 : vector<4x64xf32>
    %380 = arith.mulf %373, %379 : vector<4x64xf32>
    %381 = arith.addf %378, %380 : vector<4x64xf32>
    %382 = vector.extract_strided_slice %25 {offsets = [6, 0, 0], sizes = [1, 4, 192], strides = [1, 1, 1]} : vector<8x4x192xf32> to vector<1x4x192xf32>
    %383 = vector.shape_cast %382 : vector<1x4x192xf32> to vector<4x192xf32>
    %cst_61 = arith.constant dense<0.000000e+00> : vector<4x192xf32>
    %384 = tpu.matmul %351, %1, %cst_61 {dimension_numbers = #tpu.dot_dimension_numbers<[1], [0], [0], [1], [0, 0, 1, 1], [], []>} : vector<4x64xf32>, vector<64x192xf32>, vector<4x192xf32> -> vector<4x192xf32>
    %385 = vector.broadcast %3 : vector<1x192xf32> to vector<4x192xf32>
    %386 = arith.addf %384, %385 : vector<4x192xf32>
    %387 = vector.extract_strided_slice %383 {offsets = [0, 0], sizes = [4, 64], strides = [1, 1]} : vector<4x192xf32> to vector<4x64xf32>
    %388 = vector.extract_strided_slice %386 {offsets = [0, 0], sizes = [4, 64], strides = [1, 1]} : vector<4x192xf32> to vector<4x64xf32>
    %389 = arith.addf %387, %388 : vector<4x64xf32>
    %390 = arith.negf %389 : vector<4x64xf32>
    %391 = math.exp %390 : vector<4x64xf32>
    %cst_62 = arith.constant 1.000000e+00 : f32
    %392 = vector.broadcast %cst_62 : f32 to vector<4x64xf32>
    %393 = arith.addf %392, %391 : vector<4x64xf32>
    %394 = arith.divf %392, %393 : vector<4x64xf32>
    %395 = vector.extract_strided_slice %383 {offsets = [0, 64], sizes = [4, 64], strides = [1, 1]} : vector<4x192xf32> to vector<4x64xf32>
    %396 = vector.extract_strided_slice %386 {offsets = [0, 64], sizes = [4, 64], strides = [1, 1]} : vector<4x192xf32> to vector<4x64xf32>
    %397 = arith.addf %395, %396 : vector<4x64xf32>
    %398 = arith.negf %397 : vector<4x64xf32>
    %399 = math.exp %398 : vector<4x64xf32>
    %cst_63 = arith.constant 1.000000e+00 : f32
    %400 = vector.broadcast %cst_63 : f32 to vector<4x64xf32>
    %401 = arith.addf %400, %399 : vector<4x64xf32>
    %402 = arith.divf %400, %401 : vector<4x64xf32>
    %403 = vector.extract_strided_slice %383 {offsets = [0, 128], sizes = [4, 64], strides = [1, 1]} : vector<4x192xf32> to vector<4x64xf32>
    %404 = vector.extract_strided_slice %386 {offsets = [0, 128], sizes = [4, 64], strides = [1, 1]} : vector<4x192xf32> to vector<4x64xf32>
    %405 = arith.mulf %394, %404 : vector<4x64xf32>
    %406 = arith.addf %403, %405 : vector<4x64xf32>
    %407 = math.tanh %406 : vector<4x64xf32>
    %408 = arith.subf %351, %407 : vector<4x64xf32>
    %409 = arith.mulf %402, %408 : vector<4x64xf32>
    %410 = arith.addf %407, %409 : vector<4x64xf32>
    %cst_64 = arith.constant dense<0.000000e+00> : vector<4x192xf32>
    %411 = tpu.matmul %410, %4, %cst_64 {dimension_numbers = #tpu.dot_dimension_numbers<[1], [0], [0], [1], [0, 0, 1, 1], [], []>} : vector<4x64xf32>, vector<64x192xf32>, vector<4x192xf32> -> vector<4x192xf32>
    %412 = vector.broadcast %6 : vector<1x192xf32> to vector<4x192xf32>
    %413 = arith.addf %411, %412 : vector<4x192xf32>
    %cst_65 = arith.constant dense<0.000000e+00> : vector<4x192xf32>
    %414 = tpu.matmul %381, %5, %cst_65 {dimension_numbers = #tpu.dot_dimension_numbers<[1], [0], [0], [1], [0, 0, 1, 1], [], []>} : vector<4x64xf32>, vector<64x192xf32>, vector<4x192xf32> -> vector<4x192xf32>
    %415 = vector.broadcast %7 : vector<1x192xf32> to vector<4x192xf32>
    %416 = arith.addf %414, %415 : vector<4x192xf32>
    %417 = vector.extract_strided_slice %413 {offsets = [0, 0], sizes = [4, 64], strides = [1, 1]} : vector<4x192xf32> to vector<4x64xf32>
    %418 = vector.extract_strided_slice %416 {offsets = [0, 0], sizes = [4, 64], strides = [1, 1]} : vector<4x192xf32> to vector<4x64xf32>
    %419 = arith.addf %417, %418 : vector<4x64xf32>
    %420 = arith.negf %419 : vector<4x64xf32>
    %421 = math.exp %420 : vector<4x64xf32>
    %cst_66 = arith.constant 1.000000e+00 : f32
    %422 = vector.broadcast %cst_66 : f32 to vector<4x64xf32>
    %423 = arith.addf %422, %421 : vector<4x64xf32>
    %424 = arith.divf %422, %423 : vector<4x64xf32>
    %425 = vector.extract_strided_slice %413 {offsets = [0, 64], sizes = [4, 64], strides = [1, 1]} : vector<4x192xf32> to vector<4x64xf32>
    %426 = vector.extract_strided_slice %416 {offsets = [0, 64], sizes = [4, 64], strides = [1, 1]} : vector<4x192xf32> to vector<4x64xf32>
    %427 = arith.addf %425, %426 : vector<4x64xf32>
    %428 = arith.negf %427 : vector<4x64xf32>
    %429 = math.exp %428 : vector<4x64xf32>
    %cst_67 = arith.constant 1.000000e+00 : f32
    %430 = vector.broadcast %cst_67 : f32 to vector<4x64xf32>
    %431 = arith.addf %430, %429 : vector<4x64xf32>
    %432 = arith.divf %430, %431 : vector<4x64xf32>
    %433 = vector.extract_strided_slice %413 {offsets = [0, 128], sizes = [4, 64], strides = [1, 1]} : vector<4x192xf32> to vector<4x64xf32>
    %434 = vector.extract_strided_slice %416 {offsets = [0, 128], sizes = [4, 64], strides = [1, 1]} : vector<4x192xf32> to vector<4x64xf32>
    %435 = arith.mulf %424, %434 : vector<4x64xf32>
    %436 = arith.addf %433, %435 : vector<4x64xf32>
    %437 = math.tanh %436 : vector<4x64xf32>
    %438 = arith.subf %381, %437 : vector<4x64xf32>
    %439 = arith.mulf %432, %438 : vector<4x64xf32>
    %440 = arith.addf %437, %439 : vector<4x64xf32>
    %441 = vector.extract_strided_slice %25 {offsets = [7, 0, 0], sizes = [1, 4, 192], strides = [1, 1, 1]} : vector<8x4x192xf32> to vector<1x4x192xf32>
    %442 = vector.shape_cast %441 : vector<1x4x192xf32> to vector<4x192xf32>
    %cst_68 = arith.constant dense<0.000000e+00> : vector<4x192xf32>
    %443 = tpu.matmul %410, %1, %cst_68 {dimension_numbers = #tpu.dot_dimension_numbers<[1], [0], [0], [1], [0, 0, 1, 1], [], []>} : vector<4x64xf32>, vector<64x192xf32>, vector<4x192xf32> -> vector<4x192xf32>
    %444 = vector.broadcast %3 : vector<1x192xf32> to vector<4x192xf32>
    %445 = arith.addf %443, %444 : vector<4x192xf32>
    %446 = vector.extract_strided_slice %442 {offsets = [0, 0], sizes = [4, 64], strides = [1, 1]} : vector<4x192xf32> to vector<4x64xf32>
    %447 = vector.extract_strided_slice %445 {offsets = [0, 0], sizes = [4, 64], strides = [1, 1]} : vector<4x192xf32> to vector<4x64xf32>
    %448 = arith.addf %446, %447 : vector<4x64xf32>
    %449 = arith.negf %448 : vector<4x64xf32>
    %450 = math.exp %449 : vector<4x64xf32>
    %cst_69 = arith.constant 1.000000e+00 : f32
    %451 = vector.broadcast %cst_69 : f32 to vector<4x64xf32>
    %452 = arith.addf %451, %450 : vector<4x64xf32>
    %453 = arith.divf %451, %452 : vector<4x64xf32>
    %454 = vector.extract_strided_slice %442 {offsets = [0, 64], sizes = [4, 64], strides = [1, 1]} : vector<4x192xf32> to vector<4x64xf32>
    %455 = vector.extract_strided_slice %445 {offsets = [0, 64], sizes = [4, 64], strides = [1, 1]} : vector<4x192xf32> to vector<4x64xf32>
    %456 = arith.addf %454, %455 : vector<4x64xf32>
    %457 = arith.negf %456 : vector<4x64xf32>
    %458 = math.exp %457 : vector<4x64xf32>
    %cst_70 = arith.constant 1.000000e+00 : f32
    %459 = vector.broadcast %cst_70 : f32 to vector<4x64xf32>
    %460 = arith.addf %459, %458 : vector<4x64xf32>
    %461 = arith.divf %459, %460 : vector<4x64xf32>
    %462 = vector.extract_strided_slice %442 {offsets = [0, 128], sizes = [4, 64], strides = [1, 1]} : vector<4x192xf32> to vector<4x64xf32>
    %463 = vector.extract_strided_slice %445 {offsets = [0, 128], sizes = [4, 64], strides = [1, 1]} : vector<4x192xf32> to vector<4x64xf32>
    %464 = arith.mulf %453, %463 : vector<4x64xf32>
    %465 = arith.addf %462, %464 : vector<4x64xf32>
    %466 = math.tanh %465 : vector<4x64xf32>
    %467 = arith.subf %410, %466 : vector<4x64xf32>
    %468 = arith.mulf %461, %467 : vector<4x64xf32>
    %469 = arith.addf %466, %468 : vector<4x64xf32>
    %cst_71 = arith.constant dense<0.000000e+00> : vector<4x192xf32>
    %470 = tpu.matmul %469, %4, %cst_71 {dimension_numbers = #tpu.dot_dimension_numbers<[1], [0], [0], [1], [0, 0, 1, 1], [], []>} : vector<4x64xf32>, vector<64x192xf32>, vector<4x192xf32> -> vector<4x192xf32>
    %471 = vector.broadcast %6 : vector<1x192xf32> to vector<4x192xf32>
    %472 = arith.addf %470, %471 : vector<4x192xf32>
    %cst_72 = arith.constant dense<0.000000e+00> : vector<4x192xf32>
    %473 = tpu.matmul %440, %5, %cst_72 {dimension_numbers = #tpu.dot_dimension_numbers<[1], [0], [0], [1], [0, 0, 1, 1], [], []>} : vector<4x64xf32>, vector<64x192xf32>, vector<4x192xf32> -> vector<4x192xf32>
    %474 = vector.broadcast %7 : vector<1x192xf32> to vector<4x192xf32>
    %475 = arith.addf %473, %474 : vector<4x192xf32>
    %476 = vector.extract_strided_slice %472 {offsets = [0, 0], sizes = [4, 64], strides = [1, 1]} : vector<4x192xf32> to vector<4x64xf32>
    %477 = vector.extract_strided_slice %475 {offsets = [0, 0], sizes = [4, 64], strides = [1, 1]} : vector<4x192xf32> to vector<4x64xf32>
    %478 = arith.addf %476, %477 : vector<4x64xf32>
    %479 = arith.negf %478 : vector<4x64xf32>
    %480 = math.exp %479 : vector<4x64xf32>
    %cst_73 = arith.constant 1.000000e+00 : f32
    %481 = vector.broadcast %cst_73 : f32 to vector<4x64xf32>
    %482 = arith.addf %481, %480 : vector<4x64xf32>
    %483 = arith.divf %481, %482 : vector<4x64xf32>
    %484 = vector.extract_strided_slice %472 {offsets = [0, 64], sizes = [4, 64], strides = [1, 1]} : vector<4x192xf32> to vector<4x64xf32>
    %485 = vector.extract_strided_slice %475 {offsets = [0, 64], sizes = [4, 64], strides = [1, 1]} : vector<4x192xf32> to vector<4x64xf32>
    %486 = arith.addf %484, %485 : vector<4x64xf32>
    %487 = arith.negf %486 : vector<4x64xf32>
    %488 = math.exp %487 : vector<4x64xf32>
    %cst_74 = arith.constant 1.000000e+00 : f32
    %489 = vector.broadcast %cst_74 : f32 to vector<4x64xf32>
    %490 = arith.addf %489, %488 : vector<4x64xf32>
    %491 = arith.divf %489, %490 : vector<4x64xf32>
    %492 = vector.extract_strided_slice %472 {offsets = [0, 128], sizes = [4, 64], strides = [1, 1]} : vector<4x192xf32> to vector<4x64xf32>
    %493 = vector.extract_strided_slice %475 {offsets = [0, 128], sizes = [4, 64], strides = [1, 1]} : vector<4x192xf32> to vector<4x64xf32>
    %494 = arith.mulf %483, %493 : vector<4x64xf32>
    %495 = arith.addf %492, %494 : vector<4x64xf32>
    %496 = math.tanh %495 : vector<4x64xf32>
    %497 = arith.subf %440, %496 : vector<4x64xf32>
    %498 = arith.mulf %491, %497 : vector<4x64xf32>
    %499 = arith.addf %496, %498 : vector<4x64xf32>
    %500 = tpu.concatenate %469, %499 in 1 : vector<4x64xf32>, vector<4x64xf32> -> vector<4x128xf32>
    %c0_75 = arith.constant 0 : index
    %c0_76 = arith.constant 0 : index
    %501 = vector.load %arg9[%c0_75, %c0_76] : memref<128x1xf32, #tpu.memory_space<vmem>>, vector<128x1xf32>
    %cst_77 = arith.constant dense<0.000000e+00> : vector<4x1xf32>
    %502 = tpu.matmul %500, %501, %cst_77 {dimension_numbers = #tpu.dot_dimension_numbers<[1], [0], [0], [1], [0, 0, 1, 1], [], []>} : vector<4x128xf32>, vector<128x1xf32>, vector<4x1xf32> -> vector<4x1xf32>
    %c0_78 = arith.constant 0 : index
    %c0_79 = arith.constant 0 : index
    %503 = vector.load %arg10[%c0_78, %c0_79] : memref<1x1xf32, #tpu.memory_space<vmem>>, vector<1x1xf32>
    %504 = vector.broadcast %503 : vector<1x1xf32> to vector<4x1xf32>
    %505 = arith.addf %502, %504 : vector<4x1xf32>
    %c0_80 = arith.constant 0 : index
    %c0_81 = arith.constant 0 : index
    %506 = vector.load %arg11[%c0_80, %c0_81] : memref<4x1xf32, #tpu.memory_space<vmem>>, vector<4x1xf32>
    tpu.vector_store %arg11[%c0_80, %c0_81], %505 {strides = array<i32>} : memref<4x1xf32, #tpu.memory_space<vmem>>, vector<4x1xf32>,
    return
  }
}

</mosaic_0001>

<bundles_post_ra>
// kernel: model_forward.1
= control target key start
LH: loop header
LB: loop body
LE: loop exit
PB: predicated region body
PF: predicated region fallthrough
CT: control target
= control target key end

     0   :  { %s3968_s0 = inlined_call_operand.vmem [shape: f32[8,4,2], index: 0, kind: input, shape index: {}]   ;;  %s3969_s1 = inlined_call_operand.vmem [shape: f32[2,192], index: 1, kind: input, shape index: {}]   ;;  %s3970_s2 = inlined_call_operand.vmem [shape: f32[64,192], index: 2, kind: input, shape index: {}]   ;;  %s3971_s3 = inlined_call_operand.vmem [shape: f32[1,192], index: 3, kind: input, shape index: {}]   ;;  %s3972_s4 = inlined_call_operand.vmem [shape: f32[1,192], index: 4, kind: input, shape index: {}]   ;;  %s3973_s5 = inlined_call_operand.hbm [shape: f32[64,192], index: 5, kind: input, shape index: {}]   ;;  %s3974_s6 = inlined_call_operand.hbm [shape: f32[64,192], index: 6, kind: input, shape index: {}]   ;;  %s3975_s7 = inlined_call_operand.vmem [shape: f32[1,192], index: 7, kind: input, shape index: {}]   ;;  %s3976_s8 = inlined_call_operand.vmem [shape: f32[1,192], index: 8, kind: input, shape index: {}]   ;;  %s3977_s9 = inlined_call_operand.vmem [shape: f32[128,1], index: 9, kind: input, shape index: {}]   ;;  %s3978_s10 = inlined_call_operand.<no memory space> [shape: f32[1,1], index: 10, kind: input, shape index: {}]   ;;  %s3979_s11 = inlined_call_operand.vmem [shape: f32[4,1], index: 11, kind: output, shape index: {}]  }
   0x1   :  { %v16_v0 = vstv %s3978_s10 }
   0x2   :  { %17 = vst [vmem:[#allocation2] sm:$0x1] %v16_v0 }
   0x3   :  { %18 = vsyncpa [#allocation4], 0 }
   0x4   :  { %19 = vsyncpa [#allocation6], 0  ;;  %s3197_s19 = smov [#allocation3]   ;;  %s3149_s23 = scalar_lea.hbm %s3973_s5, 2048 }
   0x5   :  { %s35_s20 = sshll.u32 %s3197_s19, 4  ;;  %p3150_p0 = scmp.ne.s32.totalorder %s3973_s5, %s3149_s23  ;;  %s36_s20 = int_to_ptr.vmem [resolvable:$true] %s35_s20 }
   0x6   :  { %p3153_p1 = scmp.lt.u32.totalorder %s3149_s23, %s3973_s5 }
   0x8   :  { %p3155_p2 = pnand %p3153_p1, %p3150_p0 }
   0xa   :  { %3158 = shalt.err (!%p3155_p2)
}
   0xb   :  { %s3159_s10 = scalar_lea.vmem %s36_s20, 2048  ;;  %p3164_p4 = scmp.lt.s32.totalorder %s36_s20, %s36_s20 }
   0xc   :  { %p3160_p3 = scmp.ne.s32.totalorder %s36_s20, %s3159_s10  ;;  %p3165_p5 = scmp.lt.s32.totalorder %s3159_s10, %s3159_s10 }
   0xe   :  { %p3166_p6 = por %p3165_p5, %p3164_p4 }
  0x10   :  { %p3167_p7 = pnand %p3166_p6, %p3160_p3 }
  0x12   :  { %3170 = shalt.err (!%p3167_p7)
}
  0x13   :  { %s3198_s28 = smov 256   ;;  %s3199_s29 = smov 16  }
  0x14   :  { %41 = dma.hbm_to_vmem [thread:$0]  %s3973_s5, 2048, %s36_s20, [#allocation4], %s3198_s28, %s3198_s28, %s3199_s29  }
  0x15   :  { %s3200_s13 = smov [#allocation5]   ;;  %s3171_s17 = scalar_lea.hbm %s3974_s6, 2048 }
  0x16   :  { %s47_s14 = sshll.u32 %s3200_s13, 4  ;;  %p3172_p8 = scmp.ne.s32.totalorder %s3974_s6, %s3171_s17  ;;  %s48_s14 = int_to_ptr.vmem [resolvable:$true] %s47_s14 }
  0x17   :  { %p3175_p9 = scmp.lt.u32.totalorder %s3171_s17, %s3974_s6 }
  0x19   :  { %p3177_p10 = pnand %p3175_p9, %p3172_p8 }
  0x1b   :  { %3180 = shalt.err (!%p3177_p10)
}
  0x1c   :  { %s3181_s23 = scalar_lea.vmem %s48_s14, 2048  ;;  %p3186_p12 = scmp.lt.s32.totalorder %s48_s14, %s48_s14 }
  0x1d   :  { %p3182_p11 = scmp.ne.s32.totalorder %s48_s14, %s3181_s23  ;;  %p3187_p13 = scmp.lt.s32.totalorder %s3181_s23, %s3181_s23 }
  0x1f   :  { %p3188_p0 = por %p3187_p13, %p3186_p12 }
  0x21   :  { %p3189_p1 = pnand %p3188_p0, %p3182_p11 }
  0x23   :  { %3192 = shalt.err (!%p3189_p1)
}
  0x24   :  { %53 = dma.hbm_to_vmem [thread:$0]  %s3974_s6, 2048, %s48_s14, [#allocation6], %s3198_s28, %s3198_s28, %s3199_s29  }
  0x25   :  { %3193 = dma.done.wait [#allocation4], 2048  }
  0x26   :  { %3194 = vsyncadd [#allocation4], 4294965248 }
  0x27   :  { %3195 = dma.done.wait [#allocation6], 2048  }
  0x28   :  { %3196 = vsyncadd [#allocation6], 4294965248  ;;  %v3201_v1 = vmov 0.0   ;;  %v3202_v2 = vmov 0   ;;  %v70_v3 = vld [vmem:[%s3970_s2 + $0x8] sm:$0xff]  ;;  %v72_v4 = vld [vmem:[%s3970_s2 + $0x18] sm:$0xff]  ;;  %v130_v30 = vlaneseq }
  0x29   :  { %392 = vmatprep.mubr.f32.mxu1 %v3201_v1  ;;  %3050 = vset.pattern.permute.xlu0 %v3202_v2  ;;  %v69_v5 = vld [vmem:[%s3970_s2] sm:$0xff]  ;;  %v3305_v6 = vpack.c.bf16 %v72_v4, %v70_v3  ;;  %v71_v7 = vld [vmem:[%s3970_s2 + $0x10] sm:$0xff]  ;;  %v74_v8 = vld [vmem:[%s3970_s2 + $0x28] sm:$0xff]  ;;  %v3203_v27 = vmov 1   ;;  %vm324_vm0 = vcmask 523264   ;;  %vm3206_vm1 = vmmov 0  }
  0x2a   :  { %3052 = vset.pattern.permute.xlu1 %v3202_v2  ;;  %580 = vmatprep.mubr.f32.mxu0 %v3201_v1  ;;  %v76_v9 = vld [vmem:[%s3970_s2 + $0x38] sm:$0xff]  ;;  %v3316_v10 = vpack.c.bf16 %v71_v7, %v69_v5  ;;  %v73_v12 = vld [vmem:[%s3970_s2 + $0x20] sm:$0xff]  ;;  %v75_v13 = vld [vmem:[%s3970_s2 + $0x30] sm:$0xff]  ;;  %v131_v31 = vshrl.u32 %v130_v30, 7  ;;  %vm2533_vm2 = vcmask 3072  }
  0x2b   :  { %v3318_v11 = vpack.c.bf16 %v76_v9, %v74_v8  ;;  %v78_v14 = vld [vmem:[%s3970_s2 + $0x48] sm:$0xff]  ;;  %2633 = vmatprep.subr.bf16.mxu1 %v3305_v6  ;;  %v80_v15 = vld [vmem:[%s3970_s2 + $0x58] sm:$0xff]  ;;  %v3334_v16 = vpack.c.bf16 %v75_v13, %v73_v12  ;;  %v77_v18 = vld [vmem:[%s3970_s2 + $0x40] sm:$0xff] }
  0x2c   :  { %2635 = vmatpush1.bf16.msra.mxu1 %v3316_v10  ;;  %v3337_v17 = vpack.c.bf16 %v80_v15, %v78_v14  ;;  %v79_v19 = vld [vmem:[%s3970_s2 + $0x50] sm:$0xff]  ;;  %v121_v20 = vld [vmem:[%s3968_s0] sm:$0xf]  ;;  %v82_v21 = vld [vmem:[%s3970_s2 + $0x68] sm:$0xff]  ;;  %v3379_v32 = vsub.s32 0, %v131_v31  ;;  %v3384_v34 = vsub.s32 1, %v131_v31 }
  0x2d   :  { %2637 = vmatprep.subr.bf16.mxu1 %v3318_v11  ;;  %v84_v22 = vld [vmem:[%s3970_s2 + $0x78] sm:$0xff]  ;;  %142 = vperm.xlu0 %3050, %v121_v20   ;;  %v3355_v23 = vpack.c.bf16 %v79_v19, %v77_v18  ;;  %v81_v25 = vld [vmem:[%s3970_s2 + $0x60] sm:$0xff]  ;;  %v83_v26 = vld [vmem:[%s3970_s2 + $0x70] sm:$0xff]  ;;  %v187_v54 = vsub.s32 2, %v131_v31  ;;  %v269_v56 = vsub.s32 3, %v131_v31 }
  0x2e   :  { %v3358_v24 = vpack.c.bf16 %v84_v22, %v82_v21  ;;  %v3367_v28 = vpack.c.bf16 %v83_v26, %v81_v25  ;;  %v3372_v29 = vld [vmem:[%s3968_s0 + $0x4] sm:$0xf]  ;;  %v68_v33 = vld [vmem:[%s3969_s1] sm:$0xf]  ;;  %v88_v12 = vld [vmem:[#allocation3 + $0x8] sm:$0xff] }
  0x2f   :  { %v184_v35 = vrot.slane %v68_v33, %v3379_v32  ;;  %v266_v38 = vrot.slane %v68_v33, %v3384_v34  ;;  %v85_v39 = vld [vmem:[%s3971_s3] sm:$0x3]  ;;  %v188_v55 = vrot.slane %v68_v33, %v187_v54  ;;  %v270_v60 = vrot.slane %v68_v33, %v269_v56  ;;  %v89_v18 = vld [vmem:[#allocation3 + $0x10] sm:$0xff]  ;;  %v104_v19 = vld [vmem:[#allocation5 + $0x8] sm:$0xff]  ;;  %s3204_s3 = smov 64  }
  0x30   :  { %2639 = vmatpush1.bf16.msra.mxu1 %v3334_v16  ;;  %v3395_v40 = vrot.slane %v85_v39, %v3379_v32  ;;  %v86_v44 = vld [vmem:[%s3972_s4] sm:$0x3]  ;;  %v3414_v61 = vrot.slane %v85_v39, %v3384_v34  ;;  %v105_v26 = vld [vmem:[#allocation5 + $0x10] sm:$0xff] }
  0x31   :  { %2641 = vmatprep.subr.bf16.mxu1 %v3337_v17  ;;  %3051 = vset.pattern.permute.xlu0 %v3203_v27  ;;  %v3388_v37 = vrot.slane %v184_v35, %v3379_v32  ;;  %v3399_v42 = vrot.slane %v266_v38, %v3384_v34  ;;  %v3407_v47 = vrot.slane %v86_v44, %v3379_v32  ;;  %v90_v13 = vld [vmem:[#allocation3 + $0x18] sm:$0xff]  ;;  %v87_v14 = vld [vmem:[#allocation3] sm:$0xff]  ;;  %v92_v27 = vld [vmem:[#allocation3 + $0x28] sm:$0xff] }
  0x32   :  { %232 = vperm.xlu0 %3051, %v121_v20   ;;  %v3411_v59 = vrot.slane %v188_v55, %v3379_v32  ;;  %v3418_v63 = vrot.slane %v270_v60, %v3384_v34  ;;  %v3421_v0 = vrot.slane %v86_v44, %v3384_v34  ;;  %v3429_v15 = vpack.c.bf16 %v90_v13, %v88_v12  ;;  %v106_v20 = vld [vmem:[#allocation5 + $0x18] sm:$0xff]  ;;  %v103_v25 = vld [vmem:[#allocation5] sm:$0xff]  ;;  %v93_v35 = vld [vmem:[#allocation3 + $0x30] sm:$0xff] }
  0x33   :  { %v3431_v21 = vpack.c.bf16 %v89_v18, %v87_v14  ;;  %v3433_v22 = vpack.c.bf16 %v106_v20, %v104_v19  ;;  %v3436_v30 = vpack.c.bf16 %v105_v26, %v103_v25  ;;  %v94_v31 = vld [vmem:[#allocation3 + $0x38] sm:$0xff]  ;;  %v91_v33 = vld [vmem:[#allocation3 + $0x20] sm:$0xff]  ;;  %v97_v54 = vld [vmem:[#allocation3 + $0x50] sm:$0xff] }
  0x34   :  { %2643 = vmatpush1.bf16.msra.mxu1 %v3355_v23  ;;  %v3442_v38 = vpack.c.bf16 %v94_v31, %v92_v27  ;;  %v3444_v39 = vpack.c.bf16 %v93_v35, %v91_v33  ;;  %v107_v44 = vld [vmem:[#allocation5 + $0x20] sm:$0xff]  ;;  %v112_v55 = vld [vmem:[#allocation5 + $0x48] sm:$0xff]  ;;  %v114_v56 = vld [vmem:[#allocation5 + $0x58] sm:$0xff] }
  0x35   :  { %2645 = vmatprep.subr.bf16.mxu1 %v3358_v24  ;;  %2665 = vmatprep.subr.bf16.mxu0 %v3433_v22  ;;  %v116_v12 = vld [vmem:[#allocation5 + $0x68] sm:$0xff]  ;;  %v118_v13 = vld [vmem:[#allocation5 + $0x78] sm:$0xff]  ;;  %v115_v18 = vld [vmem:[#allocation5 + $0x60] sm:$0xff] }
  0x36   :  { %236 = vperm.xlu0 %3051, %v3372_v29   ;;  %2667 = vmatpush1.bf16.msra.mxu0 %v3436_v30  ;;  %v3469_v14 = vpack.c.bf16 %v118_v13, %v116_v12  ;;  %v117_v19 = vld [vmem:[#allocation5 + $0x70] sm:$0xff]  ;;  %v120_v35 = vld [vmem:[%s3976_s8] sm:$0x3] }
  0x37   :  { %v3476_v25 = vpack.c.bf16 %v117_v19, %v115_v18  ;;  %v3540_v19 = vrot.slane %v120_v35, %v3384_v34 }
  0x38   :  { %2647 = vmatpush1.bf16.msra.mxu1 %v3367_v28 }
  0x39   :  { %2649 = vmatprep.subr.bf16.mxu1 %v3429_v15 }
  0x3b   :  { %393 = vmatmul.mubr.f32.vlgmr.msra.gmra.mrb[0].mxu1 %v3201_v1 }
  0x3c   :  { %498 = vmatprep.mubr.f32.mxu1 %v3201_v1  ;;  %2651 = vmatpush1.bf16.msra.mxu1 %v3431_v21 }
  0x3d   :  { %2653 = vmatprep.subr.bf16.mxu1 %v3442_v38 }
  0x40   :  { %2655 = vmatpush1.bf16.msra.mxu1 %v3444_v39 }
  0xac   :  { %v143_v36 = vpop.permute.xlu0 %142 }
  0xad   :  { %v199_v41 = vmul.f32 %v3388_v37, %v143_v36  ;;  %v200_v62 = vmul.f32 %v3411_v59, %v143_v36 }
  0xaf   :  { %v215_v45 = vadd.f32 %v199_v41, %v3395_v40  ;;  %v216_v2 = vadd.f32 %v200_v62, %v3414_v61  ;;  %v108_v41 = vld [vmem:[#allocation5 + $0x28] sm:$0xff]  ;;  %v3460_v62 = vpack.c.bf16 %v114_v56, %v112_v55 }
  0xb1   :  { %v233_v43 = vpop.permute.xlu0 %232 }
  0xb2   :  { %v281_v46 = vmul.f32 %v3399_v42, %v233_v43  ;;  %v282_v3 = vmul.f32 %v3418_v63, %v233_v43  ;;  %v110_v43 = vld [vmem:[#allocation5 + $0x38] sm:$0xff] }
  0xb4   :  { %v297_v49 = vadd.f32 %v281_v46, %v215_v45  ;;  %v298_v7 = vadd.f32 %v282_v3, %v216_v2  ;;  %v3448_v46 = vpack.c.bf16 %v110_v43, %v108_v41  ;;  %v100_v2 = vld [vmem:[#allocation3 + $0x68] sm:$0xff]  ;;  %v102_v3 = vld [vmem:[#allocation3 + $0x78] sm:$0xff]  ;;  %v3528_v41 = vrot.slane %v120_v35, %v3379_v32 }
  0xb5   :  { %v237_v56 = vpop.permute.xlu0 %236 }
  0xb6   :  { %2669 = vmatprep.subr.bf16.mxu0 %v3448_v46  ;;  %v284_v35 = vmul.f32 %v3418_v63, %v237_v56 }
 0x10e   :  { %v394_v48 = vpop.f32.mrb[0].mxu1 }
 0x10f   :  { %v395_v50 = vadd.f32 %v394_v48, %v3407_v47  ;;  %v396_v51 = vpop.f32.mrb[1].mxu1  ;;  %v109_v48 = vld [vmem:[#allocation5 + $0x30] sm:$0xff] }
 0x110   :  { %v397_v4 = vadd.f32 %v396_v51, %v3421_v0  ;;  %v3451_v51 = vpack.c.bf16 %v109_v48, %v107_v44 }
 0x111   :  { %v399_v52 = vadd.f32 %v395_v50, %v297_v49  ;;  %v96_v49 = vld [vmem:[#allocation3 + $0x48] sm:$0xff]  ;;  %v98_v50 = vld [vmem:[#allocation3 + $0x58] sm:$0xff] }
 0x112   :  { %2671 = vmatpush1.bf16.msra.mxu0 %v3451_v51 }
 0x113   :  { %v2541_v53 = vmul.f32 -1.442695, %v399_v52  ;;  %v3453_v52 = vpack.c.bf16 %v98_v50, %v96_v49  ;;  %2673 = vmatprep.subr.bf16.mxu0 %v3460_v62 }
 0x115   :  { %3053 = vpow2.f32 %v2541_v53  ;;  %v95_v53 = vld [vmem:[#allocation3 + $0x40] sm:$0xff]  ;;  %2657 = vmatprep.subr.bf16.mxu1 %v3453_v52 }
 0x116   :  { %v3458_v60 = vpack.c.bf16 %v97_v54, %v95_v53 }
 0x118   :  { %2659 = vmatpush1.bf16.msra.mxu1 %v3458_v60 }
 0x11f   :  { %v3054_v57 = vpop.eup %3053 }
 0x120   :  { %v403_v58 = vadd.f32 1.0, %v3054_v57  ;;  %v111_v57 = vld [vmem:[#allocation5 + $0x40] sm:$0xff] }
 0x122   :  { %3055 = vrcp.f32 %v403_v58  ;;  %v113_v58 = vld [vmem:[#allocation5 + $0x50] sm:$0xff] }
 0x12c   :  { %v3426_v5 = vpop.eup %3055 }
 0x12d   :  { %v406_v8 = vmul.f32 %v3426_v5, %v397_v4  ;;  %v99_v4 = vld [vmem:[#allocation3 + $0x60] sm:$0xff] }
 0x12f   :  { %v407_v9 = vadd.f32 %v406_v8, %v298_v7  ;;  %v3464_v7 = vpack.c.bf16 %v113_v58, %v111_v57  ;;  %v3466_v8 = vpack.c.bf16 %v102_v3, %v100_v2  ;;  %v283_v58 = vmul.f32 %v3399_v42, %v237_v56 }
 0x131   :  { %3057 = vtanh.f32 %v407_v9  ;;  %v101_v9 = vld [vmem:[#allocation3 + $0x70] sm:$0xff]  ;;  %2675 = vmatpush1.bf16.msra.mxu0 %v3464_v7  ;;  %2661 = vmatprep.subr.bf16.mxu1 %v3466_v8 }
 0x132   :  { %v3472_v20 = vpack.c.bf16 %v101_v9, %v99_v4  ;;  %2677 = vmatprep.subr.bf16.mxu0 %v3469_v14 }
 0x134   :  { %2663 = vmatpush1.bf16.msra.mxu1 %v3472_v20 }
 0x135   :  { %2679 = vmatpush1.bf16.msra.mxu0 %v3476_v25  ;;  %2681 = vmatprep.subr.bf16.mxu1 %v3305_v6 }
 0x136   :  { %2697 = vmatprep.subr.bf16.mxu0 %v3429_v15 }
 0x138   :  { %581 = vmatmul.mubr.f32.vlgmr.msra.gmra.mrb[0].mxu0 %v3201_v1 }
 0x139   :  { %2699 = vmatpush1.bf16.msra.mxu0 %v3431_v21  ;;  %767 = vmatprep.mubr.f32.mxu0 %v3201_v1 }
 0x13a   :  { %2701 = vmatprep.subr.bf16.mxu0 %v3442_v38 }
 0x13b   :  { %v3438_v36 = vpop.eup %3057 }
 0x13c   :  { %v409_v45 = vsub.f32 0.0, %v3438_v36 }
 0x13d   :  { %2703 = vmatpush1.bf16.msra.mxu0 %v3444_v39 }
 0x13e   :  { %411 = vrot.lane.b32.xlu1 %v409_v45, %s3204_s3  ;;  %2705 = vmatprep.subr.bf16.mxu0 %v3453_v52 }
 0x141   :  { %2707 = vmatpush1.bf16.msra.mxu0 %v3458_v60 }
 0x142   :  { %2709 = vmatprep.subr.bf16.mxu0 %v3466_v8 }
 0x145   :  { %2711 = vmatpush1.bf16.msra.mxu0 %v3472_v20 }
 0x146   :  { %2729 = vmatprep.subr.bf16.mxu0 %v3305_v6 }
 0x1b0   :  { %v412_v26 = vpop.permute.xlu1 %411 }
 0x1b1   :  { %v414_v27 = vmul.f32 %v3426_v5, %v412_v26 }
 0x1b3   :  { %416 = vrot.lane.b32.xlu1 %v414_v27, %s3204_s3 }
 0x1b7   :  { %147 = vperm.xlu1 %3052, %v3372_v29  }
 0x20b   :  { %v582_v29 = vpop.f32.mrb[0].mxu0 }
 0x20c   :  { %v584_v5 = vpop.f32.mrb[1].mxu0  ;;  %v583_v44 = vadd.f32 %v582_v29, %v3528_v41 }
 0x20d   :  { %v585_v27 = vadd.f32 %v584_v5, %v3540_v19 }
 0x225   :  { %v417_v31 = vpop.permute.xlu1 %416 }
 0x226   :  { %v3497_v33 = vadd.f32 %v3438_v36, %v417_v31  ;;  %v119_v36 = vld [vmem:[%s3975_s7] sm:$0x3] }
 0x227   :  { %v3531_v43 = vrot.slane %v119_v36, %v3379_v32  ;;  %v3543_v26 = vrot.slane %v119_v36, %v3384_v34 }
 0x228   :  { %2542 = vmatmul.mubr.msk.f32.vlgmr.msra.gmra.mrb[2].mxu1 %vm324_vm0, %v3497_v33 }
 0x229   :  { %2683 = vmatpush1.bf16.msra.mxu1 %v3316_v10  ;;  %672 = vmatprep.mubr.f32.mxu1 %v3201_v1 }
 0x22a   :  { %2685 = vmatprep.subr.bf16.mxu1 %v3318_v11 }
 0x22d   :  { %2687 = vmatpush1.bf16.msra.mxu1 %v3334_v16 }
 0x22e   :  { %2689 = vmatprep.subr.bf16.mxu1 %v3337_v17 }
 0x231   :  { %2691 = vmatpush1.bf16.msra.mxu1 %v3355_v23 }
 0x232   :  { %2693 = vmatprep.subr.bf16.mxu1 %v3358_v24 }
 0x235   :  { %2695 = vmatpush1.bf16.msra.mxu1 %v3367_v28 }
 0x236   :  { %2713 = vmatprep.subr.bf16.mxu1 %v3433_v22  ;;  %v148_v54 = vpop.permute.xlu1 %147 }
 0x237   :  { %v201_v55 = vmul.f32 %v3388_v37, %v148_v54 }
 0x238   :  { %2544 = vmatmul.mubr.msk.f32.vlgmr.msra.gmra.mrb[4].mxu1 %vm324_vm0, %v3497_v33 }
 0x239   :  { %2715 = vmatpush1.bf16.msra.mxu1 %v3436_v30  ;;  %841 = vmatprep.mubr.f32.mxu1 %v3201_v1  ;;  %v217_v57 = vadd.f32 %v201_v55, %v3395_v40 }
 0x23a   :  { %2717 = vmatprep.subr.bf16.mxu1 %v3448_v46 }
 0x23b   :  { %v299_v3 = vadd.f32 %v283_v58, %v217_v57 }
 0x23d   :  { %2719 = vmatpush1.bf16.msra.mxu1 %v3451_v51 }
 0x23e   :  { %2721 = vmatprep.subr.bf16.mxu1 %v3460_v62 }
 0x241   :  { %2723 = vmatpush1.bf16.msra.mxu1 %v3464_v7 }
 0x242   :  { %2725 = vmatprep.subr.bf16.mxu1 %v3469_v14 }
 0x245   :  { %2727 = vmatpush1.bf16.msra.mxu1 %v3476_v25 }
 0x246   :  { %2745 = vmatprep.subr.bf16.mxu1 %v3429_v15 }
 0x2fb   :  { %v500_v45 = vpop.f32.mrb[2].mxu1 }
 0x2fc   :  { %v501_v48 = vadd.f32 %v500_v45, %v3531_v43  ;;  %v502_v49 = vpop.f32.mrb[3].mxu1 }
 0x2fd   :  { %v503_v29 = vadd.f32 %v502_v49, %v3543_v26 }
 0x2fe   :  { %v587_v50 = vadd.f32 %v583_v44, %v501_v48 }
 0x300   :  { %v2543_v53 = vmul.f32 -1.442695, %v587_v50 }
 0x302   :  { %3059 = vpow2.f32 %v2543_v53  ;;  %v202_v53 = vmul.f32 %v3411_v59, %v148_v54  ;;  %v123_v54 = vld [vmem:[%s3968_s0 + $0x8] sm:$0xf] }
 0x304   :  { %v218_v55 = vadd.f32 %v202_v53, %v3414_v61 }
 0x306   :  { %v300_v36 = vadd.f32 %v284_v35, %v218_v55 }
 0x30b   :  { %v674_v2 = vpop.f32.mrb[4].mxu1 }
 0x30c   :  { %v3060_v32 = vpop.eup %3059  ;;  %v675_v4 = vadd.f32 %v674_v2, %v3407_v47  ;;  %v676_v9 = vpop.f32.mrb[5].mxu1 }
 0x30d   :  { %v591_v12 = vadd.f32 1.0, %v3060_v32  ;;  %v677_v57 = vadd.f32 %v676_v9, %v3421_v0 }
 0x30e   :  { %v679_v13 = vadd.f32 %v675_v4, %v299_v3 }
 0x30f   :  { %3061 = vrcp.f32 %v591_v12 }
 0x310   :  { %v2545_v18 = vmul.f32 -1.442695, %v679_v13 }
 0x312   :  { %3063 = vpow2.f32 %v2545_v18 }
 0x319   :  { %v3062_v31 = vpop.eup %3061 }
 0x31a   :  { %v594_v44 = vmul.f32 %v3062_v31, %v585_v27 }
 0x31c   :  { %v3064_v45 = vpop.eup %3063  ;;  %v595_v48 = vadd.f32 %v594_v44, %v503_v29 }
 0x31d   :  { %v683_v50 = vadd.f32 1.0, %v3064_v45 }
 0x31f   :  { %3065 = vrcp.f32 %v683_v50 }
 0x329   :  { %v3066_v34 = vpop.eup %3065 }
 0x32a   :  { %v686_v58 = vmul.f32 %v3066_v34, %v677_v57 }
 0x32c   :  { %v687_v5 = vadd.f32 %v686_v58, %v300_v36 }
 0x32e   :  { %3067 = vtanh.f32 %v687_v5 }
 0x32f   :  { %3069 = vtanh.f32 %v595_v48 }
 0x338   :  { %v3068_v49 = vpop.eup %3067 }
 0x339   :  { %v689_v2 = vsub.f32 %v3497_v33, %v3068_v49  ;;  %v3070_v32 = vpop.eup %3069 }
 0x33a   :  { %v597_v3 = vsub.f32 0.0, %v3070_v32 }
 0x33b   :  { %691 = vrot.lane.b32.xlu1 %v689_v2, %s3204_s3 }
 0x33f   :  { %599 = vrot.lane.b32.xlu1 %v597_v3, %s3204_s3 }
 0x343   :  { %152 = vperm.xlu1 %3052, %v123_v54  }
 0x3ad   :  { %v692_v56 = vpop.permute.xlu1 %691 }
 0x3ae   :  { %v694_v4 = vmul.f32 %v3066_v34, %v692_v56 }
 0x3b0   :  { %696 = vrot.lane.b32.xlu0 %v694_v4, %s3204_s3 }
 0x3b1   :  { %v600_v9 = vpop.permute.xlu1 %599 }
 0x3b2   :  { %v602_v12 = vmul.f32 %v3062_v31, %v600_v9 }
 0x3b4   :  { %604 = vrot.lane.b32.xlu0 %v602_v12, %s3204_s3 }
 0x3b8   :  { %240 = vperm.xlu0 %3051, %v123_v54  }
 0x3c2   :  { %v153_v55 = vpop.permute.xlu1 %152 }
 0x3c3   :  { %v203_v34 = vmul.f32 %v3388_v37, %v153_v55 }
 0x3c5   :  { %v219_v58 = vadd.f32 %v203_v34, %v3395_v40 }
 0x422   :  { %v697_v33 = vpop.permute.xlu0 %696 }
 0x423   :  { %v3559_v13 = vadd.f32 %v3068_v49, %v697_v33 }
 0x425   :  { %2546 = vmatmul.mubr.msk.f32.vlgmr.msra.gmra.mrb[2].mxu0 %vm324_vm0, %v3559_v13 }
 0x426   :  { %2731 = vmatpush1.bf16.msra.mxu0 %v3316_v10  ;;  %v605_v18 = vpop.permute.xlu0 %604  ;;  %933 = vmatprep.mubr.f32.mxu0 %v3201_v1 }
 0x427   :  { %v3565_v27 = vadd.f32 %v3070_v32, %v605_v18  ;;  %2733 = vmatprep.subr.bf16.mxu0 %v3318_v11 }
 0x429   :  { %2547 = vmatmul.mubr.msk.f32.vlgmr.msra.gmra.mrb[6].mxu1 %vm324_vm0, %v3565_v27 }
 0x42a   :  { %2735 = vmatpush1.bf16.msra.mxu0 %v3334_v16  ;;  %2747 = vmatpush1.bf16.msra.mxu1 %v3431_v21 }
 0x42b   :  { %2737 = vmatprep.subr.bf16.mxu0 %v3337_v17  ;;  %2749 = vmatprep.subr.bf16.mxu1 %v3442_v38 }
 0x42c   :  { %1028 = vmatprep.mubr.f32.mxu1 %v3201_v1 }
 0x42e   :  { %2739 = vmatpush1.bf16.msra.mxu0 %v3355_v23  ;;  %2751 = vmatpush1.bf16.msra.mxu1 %v3444_v39 }
 0x42f   :  { %2741 = vmatprep.subr.bf16.mxu0 %v3358_v24  ;;  %2753 = vmatprep.subr.bf16.mxu1 %v3453_v52 }
 0x432   :  { %2743 = vmatpush1.bf16.msra.mxu0 %v3367_v28  ;;  %2755 = vmatpush1.bf16.msra.mxu1 %v3458_v60 }
 0x433   :  { %2761 = vmatprep.subr.bf16.mxu0 %v3433_v22  ;;  %2757 = vmatprep.subr.bf16.mxu1 %v3466_v8 }
 0x435   :  { %2549 = vmatmul.mubr.msk.f32.vlgmr.msra.gmra.mrb[4].mxu0 %vm324_vm0, %v3559_v13 }
 0x436   :  { %2763 = vmatpush1.bf16.msra.mxu0 %v3436_v30  ;;  %2759 = vmatpush1.bf16.msra.mxu1 %v3472_v20 }
 0x437   :  { %2765 = vmatprep.subr.bf16.mxu0 %v3448_v46  ;;  %2777 = vmatprep.subr.bf16.mxu1 %v3305_v6  ;;  %v241_v57 = vpop.permute.xlu0 %240 }
 0x438   :  { %1102 = vmatprep.mubr.f32.mxu0 %v3201_v1  ;;  %v285_v36 = vmul.f32 %v3399_v42, %v241_v57 }
 0x43a   :  { %2767 = vmatpush1.bf16.msra.mxu0 %v3451_v51  ;;  %v301_v49 = vadd.f32 %v285_v36, %v219_v58 }
 0x43b   :  { %2769 = vmatprep.subr.bf16.mxu0 %v3460_v62 }
 0x43e   :  { %2771 = vmatpush1.bf16.msra.mxu0 %v3464_v7 }
 0x43f   :  { %2773 = vmatprep.subr.bf16.mxu0 %v3469_v14 }
 0x442   :  { %2775 = vmatpush1.bf16.msra.mxu0 %v3476_v25 }
 0x443   :  { %2793 = vmatprep.subr.bf16.mxu0 %v3429_v15 }
 0x4f8   :  { %v769_v31 = vpop.f32.mrb[2].mxu0 }
 0x4f9   :  { %v771_v29 = vpop.f32.mrb[3].mxu0  ;;  %v770_v45 = vadd.f32 %v769_v31, %v3531_v43 }
 0x4fa   :  { %v772_v31 = vadd.f32 %v771_v29, %v3543_v26 }
 0x4fc   :  { %v843_v44 = vpop.f32.mrb[6].mxu1 }
 0x4fd   :  { %v844_v48 = vadd.f32 %v843_v44, %v3528_v41  ;;  %v845_v50 = vpop.f32.mrb[7].mxu1 }
 0x4fe   :  { %v846_v12 = vadd.f32 %v845_v50, %v3540_v19 }
 0x4ff   :  { %v848_v53 = vadd.f32 %v844_v48, %v770_v45  ;;  %v204_v48 = vmul.f32 %v3411_v59, %v153_v55 }
 0x501   :  { %v2548_v35 = vmul.f32 -1.442695, %v848_v53  ;;  %v286_v53 = vmul.f32 %v3418_v63, %v241_v57  ;;  %v124_v57 = vld [vmem:[%s3968_s0 + $0xc] sm:$0xf] }
 0x503   :  { %3071 = vpow2.f32 %v2548_v35  ;;  %v220_v35 = vadd.f32 %v204_v48, %v3414_v61 }
 0x505   :  { %v302_v58 = vadd.f32 %v286_v53, %v220_v35 }
 0x508   :  { %v935_v5 = vpop.f32.mrb[4].mxu0 }
 0x509   :  { %v936_v2 = vadd.f32 %v935_v5, %v3407_v47  ;;  %v937_v32 = vpop.f32.mrb[5].mxu0 }
 0x50a   :  { %v938_v34 = vadd.f32 %v937_v32, %v3421_v0 }
 0x50b   :  { %v940_v3 = vadd.f32 %v936_v2, %v301_v49 }
 0x50d   :  { %v3072_v54 = vpop.eup %3071  ;;  %v2550_v56 = vmul.f32 -1.442695, %v940_v3 }
 0x50e   :  { %v852_v4 = vadd.f32 1.0, %v3072_v54 }
 0x50f   :  { %3073 = vpow2.f32 %v2550_v56 }
 0x510   :  { %3075 = vrcp.f32 %v852_v4 }
 0x519   :  { %v3074_v9 = vpop.eup %3073 }
 0x51a   :  { %v3076_v33 = vpop.eup %3075  ;;  %v944_v18 = vadd.f32 1.0, %v3074_v9 }
 0x51b   :  { %v855_v44 = vmul.f32 %v3076_v33, %v846_v12 }
 0x51c   :  { %3077 = vrcp.f32 %v944_v18 }
 0x51d   :  { %v856_v45 = vadd.f32 %v855_v44, %v772_v31 }
 0x526   :  { %v3078_v36 = vpop.eup %3077 }
 0x527   :  { %v947_v5 = vmul.f32 %v3078_v36, %v938_v34 }
 0x529   :  { %v948_v49 = vadd.f32 %v947_v5, %v302_v58 }
 0x52b   :  { %3079 = vtanh.f32 %v948_v49 }
 0x52c   :  { %3081 = vtanh.f32 %v856_v45 }
 0x535   :  { %v3080_v50 = vpop.eup %3079 }
 0x536   :  { %v950_v29 = vsub.f32 %v3559_v13, %v3080_v50  ;;  %v3082_v2 = vpop.eup %3081 }
 0x537   :  { %v858_v55 = vsub.f32 %v3565_v27, %v3082_v2 }
 0x538   :  { %952 = vrot.lane.b32.xlu1 %v950_v29, %s3204_s3 }
 0x53c   :  { %860 = vrot.lane.b32.xlu1 %v858_v55, %s3204_s3 }
 0x540   :  { %157 = vperm.xlu1 %3052, %v124_v57  }
 0x5aa   :  { %v953_v32 = vpop.permute.xlu1 %952 }
 0x5ab   :  { %v955_v3 = vmul.f32 %v3078_v36, %v953_v32 }
 0x5ad   :  { %957 = vrot.lane.b32.xlu0 %v955_v3, %s3204_s3 }
 0x5ae   :  { %v861_v54 = vpop.permute.xlu1 %860 }
 0x5af   :  { %v863_v56 = vmul.f32 %v3076_v33, %v861_v54 }
 0x5b1   :  { %865 = vrot.lane.b32.xlu0 %v863_v56, %s3204_s3 }
 0x5b5   :  { %244 = vperm.xlu0 %3051, %v124_v57  }
 0x5bf   :  { %v158_v53 = vpop.permute.xlu1 %157 }
 0x5c0   :  { %v205_v36 = vmul.f32 %v3388_v37, %v158_v53 }
 0x5c2   :  { %v221_v5 = vadd.f32 %v205_v36, %v3395_v40 }
 0x61f   :  { %v958_v13 = vpop.permute.xlu0 %957 }
 0x620   :  { %v3617_v4 = vadd.f32 %v3080_v50, %v958_v13 }
 0x622   :  { %2551 = vmatmul.mubr.msk.f32.vlgmr.msra.gmra.mrb[8].mxu1 %vm324_vm0, %v3617_v4 }
 0x623   :  { %2779 = vmatpush1.bf16.msra.mxu1 %v3316_v10  ;;  %v866_v27 = vpop.permute.xlu0 %865  ;;  %1194 = vmatprep.mubr.f32.mxu1 %v3201_v1 }
 0x624   :  { %v3623_v9 = vadd.f32 %v3082_v2, %v866_v27  ;;  %2781 = vmatprep.subr.bf16.mxu1 %v3318_v11 }
 0x626   :  { %2552 = vmatmul.mubr.msk.f32.vlgmr.msra.gmra.mrb[6].mxu0 %vm324_vm0, %v3623_v9 }
 0x627   :  { %2783 = vmatpush1.bf16.msra.mxu1 %v3334_v16  ;;  %2795 = vmatpush1.bf16.msra.mxu0 %v3431_v21 }
 0x628   :  { %2785 = vmatprep.subr.bf16.mxu1 %v3337_v17  ;;  %2797 = vmatprep.subr.bf16.mxu0 %v3442_v38 }
 0x629   :  { %1289 = vmatprep.mubr.f32.mxu0 %v3201_v1 }
 0x62b   :  { %2787 = vmatpush1.bf16.msra.mxu1 %v3355_v23  ;;  %2799 = vmatpush1.bf16.msra.mxu0 %v3444_v39 }
 0x62c   :  { %2789 = vmatprep.subr.bf16.mxu1 %v3358_v24  ;;  %2801 = vmatprep.subr.bf16.mxu0 %v3453_v52 }
 0x62f   :  { %2791 = vmatpush1.bf16.msra.mxu1 %v3367_v28  ;;  %2803 = vmatpush1.bf16.msra.mxu0 %v3458_v60 }
 0x630   :  { %2809 = vmatprep.subr.bf16.mxu1 %v3433_v22  ;;  %2805 = vmatprep.subr.bf16.mxu0 %v3466_v8 }
 0x632   :  { %2554 = vmatmul.mubr.msk.f32.vlgmr.msra.gmra.mrb[10].mxu1 %vm324_vm0, %v3617_v4 }
 0x633   :  { %2811 = vmatpush1.bf16.msra.mxu1 %v3436_v30  ;;  %1363 = vmatprep.mubr.f32.mxu1 %v3201_v1 }
 0x634   :  { %2813 = vmatprep.subr.bf16.mxu1 %v3448_v46  ;;  %2807 = vmatpush1.bf16.msra.mxu0 %v3472_v20  ;;  %v245_v34 = vpop.permute.xlu0 %244 }
 0x635   :  { %2825 = vmatprep.subr.bf16.mxu0 %v3305_v6  ;;  %v287_v58 = vmul.f32 %v3399_v42, %v245_v34 }
 0x637   :  { %2815 = vmatpush1.bf16.msra.mxu1 %v3451_v51  ;;  %v303_v50 = vadd.f32 %v287_v58, %v221_v5 }
 0x638   :  { %2817 = vmatprep.subr.bf16.mxu1 %v3460_v62 }
 0x63b   :  { %2819 = vmatpush1.bf16.msra.mxu1 %v3464_v7 }
 0x63c   :  { %2821 = vmatprep.subr.bf16.mxu1 %v3469_v14 }
 0x63f   :  { %2823 = vmatpush1.bf16.msra.mxu1 %v3476_v25 }
 0x640   :  { %2841 = vmatprep.subr.bf16.mxu1 %v3429_v15 }
 0x6f5   :  { %v1030_v12 = vpop.f32.mrb[8].mxu1 }
 0x6f6   :  { %v1032_v33 = vpop.f32.mrb[9].mxu1  ;;  %v1031_v31 = vadd.f32 %v1030_v12, %v3531_v43 }
 0x6f7   :  { %v1033_v12 = vadd.f32 %v1032_v33, %v3543_v26 }
 0x6f9   :  { %v1104_v18 = vpop.f32.mrb[6].mxu0 }
 0x6fa   :  { %v1105_v44 = vadd.f32 %v1104_v18, %v3528_v41  ;;  %v1106_v45 = vpop.f32.mrb[7].mxu0 }
 0x6fb   :  { %v1107_v56 = vadd.f32 %v1106_v45, %v3540_v19 }
 0x6fc   :  { %v1109_v48 = vadd.f32 %v1105_v44, %v1031_v31  ;;  %v206_v44 = vmul.f32 %v3411_v59, %v158_v53 }
 0x6fe   :  { %v2553_v35 = vmul.f32 -1.442695, %v1109_v48  ;;  %v288_v48 = vmul.f32 %v3418_v63, %v245_v34 }
 0x700   :  { %3083 = vpow2.f32 %v2553_v35  ;;  %v222_v35 = vadd.f32 %v206_v44, %v3414_v61 }
 0x702   :  { %v304_v5 = vadd.f32 %v288_v48, %v222_v35 }
 0x705   :  { %v1196_v49 = vpop.f32.mrb[10].mxu1 }
 0x706   :  { %v1197_v29 = vadd.f32 %v1196_v49, %v3407_v47  ;;  %v1198_v2 = vpop.f32.mrb[11].mxu1 }
 0x707   :  { %v1199_v36 = vadd.f32 %v1198_v2, %v3421_v0  ;;  %v125_v2 = vld [vmem:[%s3968_s0 + $0x10] sm:$0xf] }
 0x708   :  { %v1201_v55 = vadd.f32 %v1197_v29, %v303_v50 }
 0x70a   :  { %v3084_v57 = vpop.eup %3083  ;;  %v2555_v32 = vmul.f32 -1.442695, %v1201_v55 }
 0x70b   :  { %v1113_v3 = vadd.f32 1.0, %v3084_v57 }
 0x70c   :  { %3085 = vpow2.f32 %v2555_v32 }
 0x70d   :  { %3087 = vrcp.f32 %v1113_v3 }
 0x716   :  { %v3086_v54 = vpop.eup %3085 }
 0x717   :  { %v3088_v13 = vpop.eup %3087  ;;  %v1205_v27 = vadd.f32 1.0, %v3086_v54 }
 0x718   :  { %v1116_v18 = vmul.f32 %v3088_v13, %v1107_v56 }
 0x719   :  { %3089 = vrcp.f32 %v1205_v27 }
 0x71a   :  { %v1117_v31 = vadd.f32 %v1116_v18, %v1033_v12 }
 0x71c   :  { %3091 = vtanh.f32 %v1117_v31 }
 0x723   :  { %v3090_v58 = vpop.eup %3089 }
 0x724   :  { %v1208_v49 = vmul.f32 %v3090_v58, %v1199_v36 }
 0x726   :  { %v3092_v45 = vpop.eup %3091  ;;  %v1209_v50 = vadd.f32 %v1208_v49, %v304_v5 }
 0x727   :  { %v1119_v29 = vsub.f32 %v3623_v9, %v3092_v45 }
 0x728   :  { %3093 = vtanh.f32 %v1209_v50 }
 0x729   :  { %1121 = vrot.lane.b32.xlu0 %v1119_v29, %s3204_s3 }
 0x732   :  { %v3094_v33 = vpop.eup %3093 }
 0x733   :  { %v1211_v55 = vsub.f32 %v3617_v4, %v3094_v33 }
 0x735   :  { %1213 = vrot.lane.b32.xlu1 %v1211_v55, %s3204_s3 }
 0x79b   :  { %v1122_v53 = vpop.permute.xlu0 %1121 }
 0x79c   :  { %v1124_v34 = vmul.f32 %v3088_v13, %v1122_v53 }
 0x79e   :  { %1126 = vrot.lane.b32.xlu0 %v1124_v34, %s3204_s3 }
 0x7a2   :  { %248 = vperm.xlu0 %3051, %v125_v2  }
 0x7a7   :  { %v1214_v57 = vpop.permute.xlu1 %1213 }
 0x7a8   :  { %v1216_v32 = vmul.f32 %v3090_v58, %v1214_v57 }
 0x7aa   :  { %1218 = vrot.lane.b32.xlu1 %v1216_v32, %s3204_s3 }
 0x7ae   :  { %162 = vperm.xlu1 %3052, %v125_v2  }
 0x810   :  { %v1127_v9 = vpop.permute.xlu0 %1126 }
 0x811   :  { %v3675_v3 = vadd.f32 %v3092_v45, %v1127_v9 }
 0x813   :  { %2557 = vmatmul.mubr.msk.f32.vlgmr.msra.gmra.mrb[12].mxu1 %vm324_vm0, %v3675_v3 }
 0x814   :  { %2843 = vmatpush1.bf16.msra.mxu1 %v3431_v21  ;;  %1550 = vmatprep.mubr.f32.mxu1 %v3201_v1 }
 0x815   :  { %2845 = vmatprep.subr.bf16.mxu1 %v3442_v38 }
 0x818   :  { %2847 = vmatpush1.bf16.msra.mxu1 %v3444_v39 }
 0x819   :  { %2849 = vmatprep.subr.bf16.mxu1 %v3453_v52 }
 0x81c   :  { %v1219_v4 = vpop.permute.xlu1 %1218  ;;  %2851 = vmatpush1.bf16.msra.mxu1 %v3458_v60 }
 0x81d   :  { %v3685_v54 = vadd.f32 %v3094_v33, %v1219_v4  ;;  %2853 = vmatprep.subr.bf16.mxu1 %v3466_v8 }
 0x81f   :  { %2556 = vmatmul.mubr.msk.f32.vlgmr.msra.gmra.mrb[8].mxu0 %vm324_vm0, %v3685_v54 }
 0x820   :  { %2827 = vmatpush1.bf16.msra.mxu0 %v3316_v10  ;;  %1455 = vmatprep.mubr.f32.mxu0 %v3201_v1 }
 0x821   :  { %2829 = vmatprep.subr.bf16.mxu0 %v3318_v11  ;;  %2855 = vmatpush1.bf16.msra.mxu1 %v3472_v20  ;;  %v249_v58 = vpop.permute.xlu0 %248 }
 0x822   :  { %2873 = vmatprep.subr.bf16.mxu1 %v3305_v6  ;;  %v289_v49 = vmul.f32 %v3399_v42, %v249_v58 }
 0x824   :  { %2831 = vmatpush1.bf16.msra.mxu0 %v3334_v16 }
 0x825   :  { %2833 = vmatprep.subr.bf16.mxu0 %v3337_v17 }
 0x828   :  { %2835 = vmatpush1.bf16.msra.mxu0 %v3355_v23 }
 0x829   :  { %2837 = vmatprep.subr.bf16.mxu0 %v3358_v24 }
 0x82c   :  { %2839 = vmatpush1.bf16.msra.mxu0 %v3367_v28 }
 0x82d   :  { %2857 = vmatprep.subr.bf16.mxu0 %v3433_v22  ;;  %v163_v35 = vpop.permute.xlu1 %162 }
 0x82e   :  { %v207_v36 = vmul.f32 %v3388_v37, %v163_v35 }
 0x82f   :  { %2559 = vmatmul.mubr.msk.f32.vlgmr.msra.gmra.mrb[10].mxu0 %vm324_vm0, %v3685_v54 }
 0x830   :  { %2859 = vmatpush1.bf16.msra.mxu0 %v3436_v30  ;;  %1624 = vmatprep.mubr.f32.mxu0 %v3201_v1  ;;  %v223_v5 = vadd.f32 %v207_v36, %v3395_v40  ;;  %v290_v36 = vmul.f32 %v3418_v63, %v249_v58  ;;  %v126_v58 = vld [vmem:[%s3968_s0 + $0x14] sm:$0xf] }
 0x831   :  { %2861 = vmatprep.subr.bf16.mxu0 %v3448_v46 }
 0x832   :  { %v305_v29 = vadd.f32 %v289_v49, %v223_v5 }
 0x834   :  { %2863 = vmatpush1.bf16.msra.mxu0 %v3451_v51 }
 0x835   :  { %2865 = vmatprep.subr.bf16.mxu0 %v3460_v62 }
 0x838   :  { %2867 = vmatpush1.bf16.msra.mxu0 %v3464_v7 }
 0x839   :  { %2869 = vmatprep.subr.bf16.mxu0 %v3469_v14 }
 0x83c   :  { %2871 = vmatpush1.bf16.msra.mxu0 %v3476_v25 }
 0x83d   :  { %2889 = vmatprep.subr.bf16.mxu0 %v3429_v15 }
 0x8e6   :  { %v1365_v56 = vpop.f32.mrb[12].mxu1 }
 0x8e7   :  { %v1367_v13 = vpop.f32.mrb[13].mxu1  ;;  %v1366_v12 = vadd.f32 %v1365_v56, %v3528_v41 }
 0x8e8   :  { %v1368_v57 = vadd.f32 %v1367_v13, %v3540_v19 }
 0x8f2   :  { %v1291_v27 = vpop.f32.mrb[8].mxu0 }
 0x8f3   :  { %v1292_v18 = vadd.f32 %v1291_v27, %v3531_v43  ;;  %v1293_v31 = vpop.f32.mrb[9].mxu0 }
 0x8f4   :  { %v1294_v9 = vadd.f32 %v1293_v31, %v3543_v26 }
 0x8f5   :  { %v1370_v44 = vadd.f32 %v1366_v12, %v1292_v18  ;;  %v208_v18 = vmul.f32 %v3411_v59, %v163_v35 }
 0x8f7   :  { %v2558_v48 = vmul.f32 -1.442695, %v1370_v44  ;;  %v224_v44 = vadd.f32 %v208_v18, %v3414_v61 }
 0x8f9   :  { %3095 = vpow2.f32 %v2558_v48 }
 0x902   :  { %v1457_v45 = vpop.f32.mrb[10].mxu0 }
 0x903   :  { %v3096_v50 = vpop.eup %3095  ;;  %v1458_v33 = vadd.f32 %v1457_v45, %v3407_v47  ;;  %v1459_v55 = vpop.f32.mrb[11].mxu0  ;;  %v306_v45 = vadd.f32 %v290_v36, %v224_v44 }
 0x904   :  { %v1374_v53 = vadd.f32 1.0, %v3096_v50  ;;  %v1460_v5 = vadd.f32 %v1459_v55, %v3421_v0 }
 0x905   :  { %v1462_v34 = vadd.f32 %v1458_v33, %v305_v29 }
 0x906   :  { %3097 = vrcp.f32 %v1374_v53 }
 0x907   :  { %v2560_v2 = vmul.f32 -1.442695, %v1462_v34 }
 0x909   :  { %3099 = vpow2.f32 %v2560_v2 }
 0x910   :  { %v3098_v32 = vpop.eup %3097 }
 0x911   :  { %v1377_v4 = vmul.f32 %v3098_v32, %v1368_v57 }
 0x913   :  { %v3100_v56 = vpop.eup %3099  ;;  %v1378_v27 = vadd.f32 %v1377_v4, %v1294_v9 }
 0x914   :  { %v1466_v12 = vadd.f32 1.0, %v3100_v56 }
 0x915   :  { %3101 = vtanh.f32 %v1378_v27 }
 0x916   :  { %3103 = vrcp.f32 %v1466_v12 }
 0x91f   :  { %v3102_v48 = vpop.eup %3101 }
 0x920   :  { %v3104_v49 = vpop.eup %3103  ;;  %v1380_v13 = vsub.f32 %v3675_v3, %v3102_v48 }
 0x921   :  { %v1469_v31 = vmul.f32 %v3104_v49, %v1460_v5 }
 0x922   :  { %1382 = vrot.lane.b32.xlu0 %v1380_v13, %s3204_s3 }
 0x923   :  { %v1470_v50 = vadd.f32 %v1469_v31, %v306_v45 }
 0x925   :  { %3105 = vtanh.f32 %v1470_v50 }
 0x92f   :  { %v3106_v29 = vpop.eup %3105 }
 0x930   :  { %v1472_v33 = vsub.f32 %v3685_v54, %v3106_v29 }
 0x932   :  { %1474 = vrot.lane.b32.xlu1 %v1472_v33, %s3204_s3 }
 0x994   :  { %v1383_v35 = vpop.permute.xlu0 %1382 }
 0x995   :  { %v1385_v53 = vmul.f32 %v3098_v32, %v1383_v35 }
 0x997   :  { %1387 = vrot.lane.b32.xlu0 %v1385_v53, %s3204_s3 }
 0x99b   :  { %252 = vperm.xlu0 %3051, %v126_v58  }
 0x9a4   :  { %v1475_v3 = vpop.permute.xlu1 %1474 }
 0x9a5   :  { %v1477_v55 = vmul.f32 %v3104_v49, %v1475_v3 }
 0x9a7   :  { %1479 = vrot.lane.b32.xlu1 %v1477_v55, %s3204_s3 }
 0x9ab   :  { %167 = vperm.xlu1 %3052, %v126_v58  }
 0xa09   :  { %v1388_v34 = vpop.permute.xlu0 %1387 }
 0xa0a   :  { %v3733_v2 = vadd.f32 %v3102_v48, %v1388_v34 }
 0xa0c   :  { %2562 = vmatmul.mubr.msk.f32.vlgmr.msra.gmra.mrb[12].mxu0 %vm324_vm0, %v3733_v2 }
 0xa0d   :  { %2891 = vmatpush1.bf16.msra.mxu0 %v3431_v21  ;;  %1811 = vmatprep.mubr.f32.mxu0 %v3201_v1 }
 0xa0e   :  { %2893 = vmatprep.subr.bf16.mxu0 %v3442_v38 }
 0xa11   :  { %2895 = vmatpush1.bf16.msra.mxu0 %v3444_v39 }
 0xa12   :  { %2897 = vmatprep.subr.bf16.mxu0 %v3453_v52 }
 0xa15   :  { %2899 = vmatpush1.bf16.msra.mxu0 %v3458_v60 }
 0xa16   :  { %2901 = vmatprep.subr.bf16.mxu0 %v3466_v8 }
 0xa19   :  { %v1480_v54 = vpop.permute.xlu1 %1479  ;;  %2903 = vmatpush1.bf16.msra.mxu0 %v3472_v20 }
 0xa1a   :  { %v3745_v57 = vadd.f32 %v3106_v29, %v1480_v54  ;;  %2921 = vmatprep.subr.bf16.mxu0 %v3305_v6  ;;  %v253_v5 = vpop.permute.xlu0 %252 }
 0xa1b   :  { %v291_v13 = vmul.f32 %v3399_v42, %v253_v5 }
 0xa1c   :  { %2561 = vmatmul.mubr.msk.f32.vlgmr.msra.gmra.mrb[14].mxu1 %vm324_vm0, %v3745_v57 }
 0xa1d   :  { %2875 = vmatpush1.bf16.msra.mxu1 %v3316_v10  ;;  %1716 = vmatprep.mubr.f32.mxu1 %v3201_v1 }
 0xa1e   :  { %2877 = vmatprep.subr.bf16.mxu1 %v3318_v11 }
 0xa21   :  { %2879 = vmatpush1.bf16.msra.mxu1 %v3334_v16 }
 0xa22   :  { %2881 = vmatprep.subr.bf16.mxu1 %v3337_v17 }
 0xa25   :  { %2883 = vmatpush1.bf16.msra.mxu1 %v3355_v23 }
 0xa26   :  { %2885 = vmatprep.subr.bf16.mxu1 %v3358_v24 }
 0xa29   :  { %2887 = vmatpush1.bf16.msra.mxu1 %v3367_v28 }
 0xa2a   :  { %2905 = vmatprep.subr.bf16.mxu1 %v3433_v22  ;;  %v168_v48 = vpop.permute.xlu1 %167 }
 0xa2b   :  { %v209_v36 = vmul.f32 %v3388_v37, %v168_v48 }
 0xa2c   :  { %2564 = vmatmul.mubr.msk.f32.vlgmr.msra.gmra.mrb[16].mxu1 %vm324_vm0, %v3745_v57 }
 0xa2d   :  { %2907 = vmatpush1.bf16.msra.mxu1 %v3436_v30  ;;  %1885 = vmatprep.mubr.f32.mxu1 %v3201_v1  ;;  %v225_v49 = vadd.f32 %v209_v36, %v3395_v40  ;;  %v292_v36 = vmul.f32 %v3418_v63, %v253_v5  ;;  %v127_v5 = vld [vmem:[%s3968_s0 + $0x18] sm:$0xf] }
 0xa2e   :  { %2909 = vmatprep.subr.bf16.mxu1 %v3448_v46 }
 0xa2f   :  { %v307_v50 = vadd.f32 %v291_v13, %v225_v49 }
 0xa31   :  { %2911 = vmatpush1.bf16.msra.mxu1 %v3451_v51 }
 0xa32   :  { %2913 = vmatprep.subr.bf16.mxu1 %v3460_v62 }
 0xa35   :  { %2915 = vmatpush1.bf16.msra.mxu1 %v3464_v7 }
 0xa36   :  { %2917 = vmatprep.subr.bf16.mxu1 %v3469_v14 }
 0xa39   :  { %2919 = vmatpush1.bf16.msra.mxu1 %v3476_v25 }
 0xa3a   :  { %2937 = vmatprep.subr.bf16.mxu1 %v3429_v15 }
 0xadf   :  { %v1626_v32 = vpop.f32.mrb[12].mxu0 }
 0xae0   :  { %v1628_v9 = vpop.f32.mrb[13].mxu0  ;;  %v1627_v56 = vadd.f32 %v1626_v32, %v3528_v41 }
 0xae1   :  { %v1629_v3 = vadd.f32 %v1628_v9, %v3540_v19 }
 0xaef   :  { %v1552_v4 = vpop.f32.mrb[14].mxu1 }
 0xaf0   :  { %v1553_v27 = vadd.f32 %v1552_v4, %v3531_v43  ;;  %v1554_v12 = vpop.f32.mrb[15].mxu1 }
 0xaf1   :  { %v1555_v34 = vadd.f32 %v1554_v12, %v3543_v26 }
 0xaf2   :  { %v1631_v18 = vadd.f32 %v1627_v56, %v1553_v27  ;;  %v210_v27 = vmul.f32 %v3411_v59, %v168_v48 }
 0xaf4   :  { %v2563_v44 = vmul.f32 -1.442695, %v1631_v18  ;;  %v226_v18 = vadd.f32 %v210_v27, %v3414_v61 }
 0xaf6   :  { %3107 = vpow2.f32 %v2563_v44 }
 0xaff   :  { %v1718_v45 = vpop.f32.mrb[16].mxu1 }
 0xb00   :  { %v3108_v31 = vpop.eup %3107  ;;  %v1719_v29 = vadd.f32 %v1718_v45, %v3407_v47  ;;  %v1720_v33 = vpop.f32.mrb[17].mxu1  ;;  %v308_v45 = vadd.f32 %v292_v36, %v226_v18 }
 0xb01   :  { %v1635_v35 = vadd.f32 1.0, %v3108_v31  ;;  %v1721_v49 = vadd.f32 %v1720_v33, %v3421_v0 }
 0xb02   :  { %v1723_v53 = vadd.f32 %v1719_v29, %v307_v50 }
 0xb03   :  { %3109 = vrcp.f32 %v1635_v35 }
 0xb04   :  { %v2565_v58 = vmul.f32 -1.442695, %v1723_v53 }
 0xb06   :  { %3111 = vpow2.f32 %v2565_v58 }
 0xb0d   :  { %v3110_v55 = vpop.eup %3109 }
 0xb0e   :  { %v1638_v54 = vmul.f32 %v3110_v55, %v1629_v3 }
 0xb10   :  { %v3112_v32 = vpop.eup %3111  ;;  %v1639_v4 = vadd.f32 %v1638_v54, %v1555_v34 }
 0xb11   :  { %v1727_v56 = vadd.f32 1.0, %v3112_v32 }
 0xb12   :  { %3113 = vtanh.f32 %v1639_v4 }
 0xb13   :  { %3115 = vrcp.f32 %v1727_v56 }
 0xb1c   :  { %v3114_v44 = vpop.eup %3113 }
 0xb1d   :  { %v3116_v13 = vpop.eup %3115  ;;  %v1641_v9 = vsub.f32 %v3733_v2, %v3114_v44 }
 0xb1e   :  { %v1730_v12 = vmul.f32 %v3116_v13, %v1721_v49 }
 0xb1f   :  { %1643 = vrot.lane.b32.xlu0 %v1641_v9, %s3204_s3 }
 0xb20   :  { %v1731_v31 = vadd.f32 %v1730_v12, %v308_v45 }
 0xb22   :  { %3117 = vtanh.f32 %v1731_v31 }
 0xb2c   :  { %v3118_v50 = vpop.eup %3117 }
 0xb2d   :  { %v1733_v29 = vsub.f32 %v3745_v57, %v3118_v50 }
 0xb2f   :  { %1735 = vrot.lane.b32.xlu1 %v1733_v29, %s3204_s3 }
 0xb91   :  { %v1644_v48 = vpop.permute.xlu0 %1643 }
 0xb92   :  { %v1646_v35 = vmul.f32 %v3110_v55, %v1644_v48 }
 0xb94   :  { %1648 = vrot.lane.b32.xlu0 %v1646_v35, %s3204_s3 }
 0xb98   :  { %256 = vperm.xlu0 %3051, %v127_v5  }
 0xba1   :  { %v1736_v2 = vpop.permute.xlu1 %1735 }
 0xba2   :  { %v1738_v33 = vmul.f32 %v3116_v13, %v1736_v2 }
 0xba4   :  { %1740 = vrot.lane.b32.xlu1 %v1738_v33, %s3204_s3 }
 0xba8   :  { %172 = vperm.xlu1 %3052, %v127_v5  }
 0xc06   :  { %v1649_v53 = vpop.permute.xlu0 %1648 }
 0xc07   :  { %v3791_v58 = vadd.f32 %v3114_v44, %v1649_v53 }
 0xc09   :  { %2567 = vmatmul.mubr.msk.f32.vlgmr.msra.gmra.mrb[18].mxu1 %vm324_vm0, %v3791_v58 }
 0xc0a   :  { %2939 = vmatpush1.bf16.msra.mxu1 %v3431_v21  ;;  %2072 = vmatprep.mubr.f32.mxu1 %v3201_v1 }
 0xc0b   :  { %2941 = vmatprep.subr.bf16.mxu1 %v3442_v38 }
 0xc0e   :  { %2943 = vmatpush1.bf16.msra.mxu1 %v3444_v39 }
 0xc0f   :  { %2945 = vmatprep.subr.bf16.mxu1 %v3453_v52 }
 0xc12   :  { %2947 = vmatpush1.bf16.msra.mxu1 %v3458_v60 }
 0xc13   :  { %2949 = vmatprep.subr.bf16.mxu1 %v3466_v8 }
 0xc16   :  { %v1741_v57 = vpop.permute.xlu1 %1740  ;;  %2951 = vmatpush1.bf16.msra.mxu1 %v3472_v20 }
 0xc17   :  { %v3803_v3 = vadd.f32 %v3118_v50, %v1741_v57  ;;  %2969 = vmatprep.subr.bf16.mxu1 %v3305_v6  ;;  %v257_v36 = vpop.permute.xlu0 %256 }
 0xc18   :  { %v293_v13 = vmul.f32 %v3399_v42, %v257_v36 }
 0xc19   :  { %2566 = vmatmul.mubr.msk.f32.vlgmr.msra.gmra.mrb[14].mxu0 %vm324_vm0, %v3803_v3 }
 0xc1a   :  { %2923 = vmatpush1.bf16.msra.mxu0 %v3316_v10  ;;  %1977 = vmatprep.mubr.f32.mxu0 %v3201_v1 }
 0xc1b   :  { %2925 = vmatprep.subr.bf16.mxu0 %v3318_v11 }
 0xc1e   :  { %2927 = vmatpush1.bf16.msra.mxu0 %v3334_v16 }
 0xc1f   :  { %2929 = vmatprep.subr.bf16.mxu0 %v3337_v17 }
 0xc22   :  { %2931 = vmatpush1.bf16.msra.mxu0 %v3355_v23 }
 0xc23   :  { %2933 = vmatprep.subr.bf16.mxu0 %v3358_v24 }
 0xc26   :  { %2935 = vmatpush1.bf16.msra.mxu0 %v3367_v28 }
 0xc27   :  { %2953 = vmatprep.subr.bf16.mxu0 %v3433_v22  ;;  %v173_v18 = vpop.permute.xlu1 %172 }
 0xc28   :  { %v211_v44 = vmul.f32 %v3388_v37, %v173_v18 }
 0xc29   :  { %2569 = vmatmul.mubr.msk.f32.vlgmr.msra.gmra.mrb[16].mxu0 %vm324_vm0, %v3803_v3 }
 0xc2a   :  { %2955 = vmatpush1.bf16.msra.mxu0 %v3436_v30  ;;  %2146 = vmatprep.mubr.f32.mxu0 %v3201_v1  ;;  %v227_v49 = vadd.f32 %v211_v44, %v3395_v40 }
 0xc2b   :  { %2957 = vmatprep.subr.bf16.mxu0 %v3448_v46 }
 0xc2c   :  { %v309_v45 = vadd.f32 %v293_v13, %v227_v49 }
 0xc2e   :  { %2959 = vmatpush1.bf16.msra.mxu0 %v3451_v51 }
 0xc2f   :  { %2961 = vmatprep.subr.bf16.mxu0 %v3460_v62 }
 0xc32   :  { %2963 = vmatpush1.bf16.msra.mxu0 %v3464_v7 }
 0xc33   :  { %2965 = vmatprep.subr.bf16.mxu0 %v3469_v14 }
 0xc36   :  { %2967 = vmatpush1.bf16.msra.mxu0 %v3476_v25 }
 0xc37   :  { %2985 = vmatprep.subr.bf16.mxu0 %v3429_v15 }
 0xcdc   :  { %v1887_v6 = vpop.f32.mrb[18].mxu1 }
 0xcdd   :  { %v1889_v55 = vpop.f32.mrb[19].mxu1  ;;  %v1888_v54 = vadd.f32 %v1887_v6, %v3528_v41 }
 0xcde   :  { %v1890_v35 = vadd.f32 %v1889_v55, %v3540_v19 }
 0xcec   :  { %v1813_v34 = vpop.f32.mrb[14].mxu0 }
 0xced   :  { %v1814_v32 = vadd.f32 %v1813_v34, %v3531_v43  ;;  %v1815_v4 = vpop.f32.mrb[15].mxu0  ;;  %v212_v34 = vmul.f32 %v3411_v59, %v173_v18 }
 0xcee   :  { %v1816_v2 = vadd.f32 %v1815_v4, %v3543_v26 }
 0xcef   :  { %v1892_v56 = vadd.f32 %v1888_v54, %v1814_v32  ;;  %v228_v54 = vadd.f32 %v212_v34, %v3414_v61 }
 0xcf1   :  { %v2568_v27 = vmul.f32 -1.442695, %v1892_v56  ;;  %v294_v56 = vmul.f32 %v3418_v63, %v257_v36  ;;  %v128_v36 = vld [vmem:[%s3968_s0 + $0x1c] sm:$0xf] }
 0xcf3   :  { %3119 = vpow2.f32 %v2568_v27  ;;  %v310_v49 = vadd.f32 %v294_v56, %v228_v54 }
 0xcfc   :  { %v1979_v15 = vpop.f32.mrb[16].mxu0 }
 0xcfd   :  { %v3120_v9 = vpop.eup %3119  ;;  %v1980_v12 = vadd.f32 %v1979_v15, %v3407_v47  ;;  %v1981_v31 = vpop.f32.mrb[17].mxu0 }
 0xcfe   :  { %v1896_v50 = vadd.f32 1.0, %v3120_v9  ;;  %v1982_v27 = vadd.f32 %v1981_v31, %v3421_v0 }
 0xcff   :  { %v1984_v29 = vadd.f32 %v1980_v12, %v309_v45 }
 0xd00   :  { %3121 = vrcp.f32 %v1896_v50 }
 0xd01   :  { %v2570_v48 = vmul.f32 -1.442695, %v1984_v29 }
 0xd03   :  { %3123 = vpow2.f32 %v2570_v48 }
 0xd0a   :  { %v3122_v5 = vpop.eup %3121 }
 0xd0b   :  { %v1899_v33 = vmul.f32 %v3122_v5, %v1890_v35 }
 0xd0d   :  { %v3124_v53 = vpop.eup %3123  ;;  %v1900_v57 = vadd.f32 %v1899_v33, %v1816_v2 }
 0xd0e   :  { %v1988_v6 = vadd.f32 1.0, %v3124_v53 }
 0xd0f   :  { %3125 = vtanh.f32 %v1900_v57 }
 0xd10   :  { %3127 = vrcp.f32 %v1988_v6 }
 0xd19   :  { %v3126_v32 = vpop.eup %3125 }
 0xd1a   :  { %v3128_v44 = vpop.eup %3127  ;;  %v1902_v55 = vsub.f32 %v3791_v58, %v3126_v32 }
 0xd1b   :  { %v1991_v4 = vmul.f32 %v3128_v44, %v1982_v27 }
 0xd1c   :  { %1904 = vrot.lane.b32.xlu0 %v1902_v55, %s3204_s3 }
 0xd1d   :  { %v1992_v13 = vadd.f32 %v1991_v4, %v310_v49 }
 0xd1f   :  { %3129 = vtanh.f32 %v1992_v13 }
 0xd29   :  { %v3130_v15 = vpop.eup %3129 }
 0xd2a   :  { %v1994_v9 = vsub.f32 %v3803_v3, %v3130_v15 }
 0xd2c   :  { %1996 = vrot.lane.b32.xlu1 %v1994_v9, %s3204_s3 }
 0xd8e   :  { %v1905_v18 = vpop.permute.xlu0 %1904 }
 0xd8f   :  { %v1907_v45 = vmul.f32 %v3122_v5, %v1905_v18 }
 0xd91   :  { %1909 = vrot.lane.b32.xlu0 %v1907_v45, %s3204_s3 }
 0xd95   :  { %260 = vperm.xlu0 %3051, %v128_v36  }
 0xd9e   :  { %v1997_v58 = vpop.permute.xlu1 %1996 }
 0xd9f   :  { %v1999_v12 = vmul.f32 %v3128_v44, %v1997_v58 }
 0xda1   :  { %2001 = vrot.lane.b32.xlu1 %v1999_v12, %s3204_s3 }
 0xda5   :  { %177 = vperm.xlu1 %3052, %v128_v36  }
 0xe03   :  { %v1910_v31 = vpop.permute.xlu0 %1909 }
 0xe04   :  { %v3849_v50 = vadd.f32 %v3126_v32, %v1910_v31 }
 0xe06   :  { %2572 = vmatmul.mubr.msk.f32.vlgmr.msra.gmra.mrb[18].mxu0 %vm324_vm0, %v3849_v50 }
 0xe07   :  { %2987 = vmatpush1.bf16.msra.mxu0 %v3431_v21  ;;  %2333 = vmatprep.mubr.f32.mxu0 %v3201_v1 }
 0xe08   :  { %2989 = vmatprep.subr.bf16.mxu0 %v3442_v38 }
 0xe0b   :  { %2991 = vmatpush1.bf16.msra.mxu0 %v3444_v39 }
 0xe0c   :  { %2993 = vmatprep.subr.bf16.mxu0 %v3453_v52 }
 0xe0f   :  { %2995 = vmatpush1.bf16.msra.mxu0 %v3458_v60 }
 0xe10   :  { %2997 = vmatprep.subr.bf16.mxu0 %v3466_v8 }
 0xe13   :  { %v2002_v3 = vpop.permute.xlu1 %2001  ;;  %2999 = vmatpush1.bf16.msra.mxu0 %v3472_v20 }
 0xe14   :  { %v3861_v29 = vadd.f32 %v3130_v15, %v2002_v3  ;;  %v261_v38 = vpop.permute.xlu0 %260 }
 0xe15   :  { %v296_v53 = vmul.f32 %v3418_v63, %v261_v38 }
 0xe16   :  { %2571 = vmatmul.mubr.msk.f32.vlgmr.msra.gmra.mrb[20].mxu1 %vm324_vm0, %v3861_v29 }
 0xe17   :  { %2971 = vmatpush1.bf16.msra.mxu1 %v3316_v10  ;;  %2238 = vmatprep.mubr.f32.mxu1 %v3201_v1 }
 0xe18   :  { %2973 = vmatprep.subr.bf16.mxu1 %v3318_v11 }
 0xe1b   :  { %2975 = vmatpush1.bf16.msra.mxu1 %v3334_v16 }
 0xe1c   :  { %2977 = vmatprep.subr.bf16.mxu1 %v3337_v17 }
 0xe1f   :  { %2979 = vmatpush1.bf16.msra.mxu1 %v3355_v23 }
 0xe20   :  { %2981 = vmatprep.subr.bf16.mxu1 %v3358_v24 }
 0xe23   :  { %2983 = vmatpush1.bf16.msra.mxu1 %v3367_v28 }
 0xe24   :  { %3001 = vmatprep.subr.bf16.mxu1 %v3433_v22  ;;  %v178_v22 = vpop.permute.xlu1 %177 }
 0xe25   :  { %v214_v2 = vmul.f32 %v3411_v59, %v178_v22 }
 0xe26   :  { %2574 = vmatmul.mubr.msk.f32.vlgmr.msra.gmra.mrb[22].mxu1 %vm324_vm0, %v3861_v29 }
 0xe27   :  { %3003 = vmatpush1.bf16.msra.mxu1 %v3436_v30  ;;  %2407 = vmatprep.mubr.f32.mxu1 %v3201_v1  ;;  %v213_v30 = vmul.f32 %v3388_v37, %v178_v22 }
 0xe28   :  { %3005 = vmatprep.subr.bf16.mxu1 %v3448_v46  ;;  %v295_v46 = vmul.f32 %v3399_v42, %v261_v38  ;;  %v2445_v38 = vld [vmem:[%s3977_s9 + $0x28] sm:$0xff] }
 0xe29   :  { %v229_v39 = vadd.f32 %v213_v30, %v3395_v40  ;;  %v2444_v30 = vld [vmem:[%s3977_s9 + $0x20] sm:$0xff] }
 0xe2b   :  { %3007 = vmatpush1.bf16.msra.mxu1 %v3451_v51  ;;  %v311_v60 = vadd.f32 %v295_v46, %v229_v39  ;;  %v3023_v39 = vpack.c.bf16 %v2445_v38, %v2444_v30 }
 0xe2c   :  { %3009 = vmatprep.subr.bf16.mxu1 %v3460_v62 }
 0xe2f   :  { %3011 = vmatpush1.bf16.msra.mxu1 %v3464_v7 }
 0xe30   :  { %3013 = vmatprep.subr.bf16.mxu1 %v3469_v14 }
 0xe33   :  { %3015 = vmatpush1.bf16.msra.mxu1 %v3476_v25 }
 0xed9   :  { %v2148_v10 = vpop.f32.mrb[18].mxu0 }
 0xeda   :  { %v2150_v11 = vpop.f32.mrb[19].mxu0  ;;  %v2149_v17 = vadd.f32 %v2148_v10, %v3528_v41 }
 0xedb   :  { %v2151_v25 = vadd.f32 %v2150_v11, %v3540_v19 }
 0xee9   :  { %v2074_v16 = vpop.f32.mrb[20].mxu1 }
 0xeea   :  { %v2075_v23 = vadd.f32 %v2074_v16, %v3531_v43  ;;  %v2076_v24 = vpop.f32.mrb[21].mxu1 }
 0xeeb   :  { %v2077_v37 = vadd.f32 %v2076_v24, %v3543_v26 }
 0xeec   :  { %v2153_v28 = vadd.f32 %v2149_v17, %v2075_v23 }
 0xeee   :  { %v2573_v21 = vmul.f32 -1.442695, %v2153_v28 }
 0xef0   :  { %3131 = vpow2.f32 %v2573_v21  ;;  %v2443_v21 = vld [vmem:[%s3977_s9 + $0x18] sm:$0xff] }
 0xef9   :  { %v2240_v51 = vpop.f32.mrb[22].mxu1 }
 0xefa   :  { %v3132_v52 = vpop.eup %3131  ;;  %v2241_v62 = vadd.f32 %v2240_v51, %v3407_v47  ;;  %v2242_v7 = vpop.f32.mrb[23].mxu1  ;;  %v230_v47 = vadd.f32 %v214_v2, %v3414_v61  ;;  %v2446_v51 = vld [vmem:[%s3977_s9 + $0x30] sm:$0xff] }
 0xefb   :  { %v2157_v8 = vadd.f32 1.0, %v3132_v52  ;;  %v2243_v57 = vadd.f32 %v2242_v7, %v3421_v0  ;;  %v2447_v52 = vld [vmem:[%s3977_s9 + $0x38] sm:$0xff]  ;;  %v2448_v7 = vld [vmem:[%s3977_s9 + $0x40] sm:$0xff] }
 0xefc   :  { %v2245_v14 = vadd.f32 %v2241_v62, %v311_v60  ;;  %v312_v54 = vadd.f32 %v296_v53, %v230_v47  ;;  %v3026_v62 = vpack.c.bf16 %v2447_v52, %v2446_v51 }
 0xefd   :  { %3133 = vrcp.f32 %v2157_v8  ;;  %v2449_v8 = vld [vmem:[%s3977_s9 + $0x48] sm:$0xff] }
 0xefe   :  { %v2575_v20 = vmul.f32 -1.442695, %v2245_v14  ;;  %v3029_v14 = vpack.c.bf16 %v2449_v8, %v2448_v7 }
 0xf00   :  { %3135 = vpow2.f32 %v2575_v20  ;;  %v2450_v20 = vld [vmem:[%s3977_s9 + $0x50] sm:$0xff] }
 0xf07   :  { %v3134_v48 = vpop.eup %3133 }
 0xf08   :  { %v2160_v35 = vmul.f32 %v3134_v48, %v2151_v25  ;;  %v2451_v25 = vld [vmem:[%s3977_s9 + $0x58] sm:$0xff] }
 0xf0a   :  { %v3136_v40 = vpop.eup %3135  ;;  %v2161_v5 = vadd.f32 %v2160_v35, %v2077_v37  ;;  %v2452_v37 = vld [vmem:[%s3977_s9 + $0x60] sm:$0xff]  ;;  %v2453_v35 = vld [vmem:[%s3977_s9 + $0x68] sm:$0xff] }
 0xf0b   :  { %v2249_v42 = vadd.f32 1.0, %v3136_v40  ;;  %v3035_v40 = vpack.c.bf16 %v2453_v35, %v2452_v37 }
 0xf0c   :  { %3137 = vtanh.f32 %v2161_v5  ;;  %v2454_v5 = vld [vmem:[%s3977_s9 + $0x70] sm:$0xff] }
 0xf0d   :  { %3139 = vrcp.f32 %v2249_v42  ;;  %v2455_v42 = vld [vmem:[%s3977_s9 + $0x78] sm:$0xff] }
 0xf0e   :  { %v3038_v2 = vpack.c.bf16 %v2455_v42, %v2454_v5 }
 0xf16   :  { %v3138_v33 = vpop.eup %3137 }
 0xf17   :  { %v3140_v6 = vpop.eup %3139  ;;  %v2163_v34 = vsub.f32 %v3849_v50, %v3138_v33 }
 0xf18   :  { %v2252_v32 = vmul.f32 %v3140_v6, %v2243_v57 }
 0xf19   :  { %2165 = vrot.lane.b32.xlu1 %v2163_v34, %s3204_s3 }
 0xf1a   :  { %v2253_v56 = vadd.f32 %v2252_v32, %v312_v54 }
 0xf1c   :  { %3141 = vtanh.f32 %v2253_v56 }
 0xf26   :  { %v3142_v27 = vpop.eup %3141 }
 0xf27   :  { %v2255_v44 = vsub.f32 %v3861_v29, %v3142_v27 }
 0xf29   :  { %2257 = vrot.lane.b32.xlu0 %v2255_v44, %s3204_s3 }
 0xf8b   :  { %v2166_v59 = vpop.permute.xlu1 %2165 }
 0xf8c   :  { %v2168_v61 = vmul.f32 %v3134_v48, %v2166_v59  ;;  %v3032_v48 = vpack.c.bf16 %v2451_v25, %v2450_v20 }
 0xf8e   :  { %2170 = vrot.lane.b32.xlu1 %v2168_v61, %s3204_s3 }
 0xf9b   :  { %v2258_v63 = vpop.permute.xlu0 %2257 }
 0xf9c   :  { %v2260_v0 = vmul.f32 %v3140_v6, %v2258_v63  ;;  %v2579_v6 = vld [vmem:[#allocation2] ss:$0 sm:$0xff] }
 0xf9e   :  { %2262 = vrot.lane.b32.xlu0 %v2260_v0, %s3204_s3 }
0x1000   :  { %v2171_v55 = vpop.permute.xlu1 %2170 }
0x1001   :  { %v2173_v49 = vadd.f32 %v3138_v33, %v2171_v55 }
0x1003   :  { %2577 = vmatmul.mubr.msk.f32.vlgmr.msra.gmra.mrb[24].mxu1 %vm324_vm0, %v2173_v49 }
0x1010   :  { %v2263_v4 = vpop.permute.xlu0 %2262 }
0x1011   :  { %v3903_v13 = vadd.f32 %v3142_v27, %v2263_v4 }
0x1013   :  { %2576 = vmatmul.mubr.msk.f32.vlgmr.msra.gmra.mrb[20].mxu0 %vm324_vm0, %v3903_v13 }
0x1014   :  { %2629 = vmatprep.mubr.msk.f32.mxu0 %vm3206_vm1, %v3201_v1 }
0x10d6   :  { %v2409_v15 = vpop.f32.mrb[24].mxu1 }
0x10d7   :  { %v2411_v9 = vpop.f32.mrb[25].mxu1  ;;  %v2410_v45 = vadd.f32 %v2409_v15, %v3528_v41  ;;  %v2440_v41 = vld [vmem:[%s3977_s9] sm:$0xff] }
0x10d8   :  { %v2412_v29 = vadd.f32 %v2411_v9, %v3540_v19  ;;  %v2442_v19 = vld [vmem:[%s3977_s9 + $0x10] sm:$0xff] }
0x10d9   :  { %v3020_v22 = vpack.c.bf16 %v2443_v21, %v2442_v19 }
0x10e6   :  { %v2335_v18 = vpop.f32.mrb[20].mxu0 }
0x10e7   :  { %v2336_v36 = vadd.f32 %v2335_v18, %v3531_v43  ;;  %v2337_v58 = vpop.f32.mrb[21].mxu0  ;;  %v2441_v43 = vld [vmem:[%s3977_s9 + $0x8] sm:$0xff] }
0x10e8   :  { %v2338_v11 = vadd.f32 %v2337_v58, %v3543_v26  ;;  %v3205_v26 = vmov 0.0|0.0   ;;  %v3017_v28 = vpack.c.bf16 %v2441_v43, %v2440_v41 }
0x10e9   :  { %v2414_v12 = vadd.f32 %v2410_v45, %v2336_v36  ;;  %3016 = vmatprep.subr.bf16.mxu0 %v3205_v26 }
0x10ea   :  { %3018 = vmatpush3.bf16.msra.mxu0 %v3017_v28 }
0x10eb   :  { %v2578_v31 = vmul.f32 -1.442695, %v2414_v12  ;;  %3019 = vmatprep.subr.bf16.mxu0 %v3205_v26 }
0x10ed   :  { %3143 = vpow2.f32 %v2578_v31 }
0x10ee   :  { %3021 = vmatpush3.bf16.msra.mxu0 %v3020_v22 }
0x10ef   :  { %3022 = vmatprep.subr.bf16.mxu0 %v3205_v26 }
0x10f2   :  { %3024 = vmatpush3.bf16.msra.mxu0 %v3023_v39 }
0x10f3   :  { %3025 = vmatprep.subr.bf16.mxu0 %v3205_v26 }
0x10f6   :  { %3027 = vmatpush3.bf16.msra.mxu0 %v3026_v62 }
0x10f7   :  { %v3144_v50 = vpop.eup %3143  ;;  %3028 = vmatprep.subr.bf16.mxu0 %v3205_v26 }
0x10f8   :  { %v2418_v3 = vadd.f32 1.0, %v3144_v50 }
0x10fa   :  { %3145 = vrcp.f32 %v2418_v3  ;;  %3030 = vmatpush3.bf16.msra.mxu0 %v3029_v14 }
0x10fb   :  { %3031 = vmatprep.subr.bf16.mxu0 %v3205_v26 }
0x10fe   :  { %3033 = vmatpush3.bf16.msra.mxu0 %v3032_v48 }
0x10ff   :  { %3034 = vmatprep.subr.bf16.mxu0 %v3205_v26 }
0x1102   :  { %3036 = vmatpush3.bf16.msra.mxu0 %v3035_v40 }
0x1103   :  { %3037 = vmatprep.subr.bf16.mxu0 %v3205_v26 }
0x1104   :  { %v3146_v10 = vpop.eup %3145 }
0x1105   :  { %v2421_v16 = vmul.f32 %v3146_v10, %v2412_v29 }
0x1106   :  { %3039 = vmatpush3.bf16.msra.mxu0 %v3038_v2 }
0x1107   :  { %v2422_v17 = vadd.f32 %v2421_v16, %v2338_v11 }
0x1109   :  { %3147 = vtanh.f32 %v2422_v17 }
0x1113   :  { %v3148_v23 = vpop.eup %3147 }
0x1114   :  { %v2424_v24 = vsub.f32 %v2173_v49, %v3148_v23 }
0x1116   :  { %2426 = vrot.lane.b32.xlu1 %v2424_v24, %s3204_s3 }
0x1188   :  { %v2427_v46 = vpop.permute.xlu1 %2426 }
0x1189   :  { %v2429_v60 = vmul.f32 %v3146_v10, %v2427_v46 }
0x118b   :  { %2431 = vrot.lane.b32.xlu0 %v2429_v60, %s3204_s3 }
0x11fd   :  { %v2432_v47 = vpop.permute.xlu0 %2431 }
0x11fe   :  { %v2434_v33 = vadd.f32 %v3148_v23, %v2432_v47 }
0x1200   :  { %2436 = vrot.lane.b32.xlu1 %v2434_v33, %s3204_s3 }
0x1272   :  { %v2437_v53 = vpop.permute.xlu1 %2436 }
0x1273   :  { %v2439_v57 = vsel %vm324_vm0, %v3903_v13, %v2437_v53 }
0x1274   :  { %2630 = vmatmul.mubr.f32.vlgmr.msra.gmra.mrb[22].mxu0 %v2439_v57 }
0x1347   :  { %v2529_v34 = vpop.f32.mrb[22].mxu0 }
0x1348   :  { %v2530_v54 = vadd.f32 %v2579_v6, %v2529_v34  ;;  %v2631_v32 = vpop.f32.mrb[23].mxu0 }
0x134a   :  { %2534 = vst.msk [vmem:[%s3979_s11] sm:$0xf] %vm2533_vm2, %v2530_v54 }
0x134b   :  { %2539 = vsyncpa [#allocation4], 1 }
0x134c   :  { %2540 = vsyncpa [#allocation6], 1 }

</bundles_post_ra>
